<compile_context>
chip_gen: v7x
topology: tpu7x:2x2x1
jax: 0.10.0
libtpu: 0.0.40
codegen_flags: <defaults>
</compile_context>

<pallas_src>
import functools
import math

import jax
import jax.numpy as jnp
from jax import lax
from jax.experimental import pallas as pl
from jax.experimental.pallas import tpu as pltpu


LANE = 128                     # pad K / C_out to multiples of 128 lanes
DEF_TILE_P = 512               # row tile: 512x128 bf16/f32 tiles << scoped VMEM
VMEM_LIMIT = 32 * 1024 * 1024  # explicit budget; fits v5e/v6e/v7x scoped VMEM
MXU_DTYPE = jnp.bfloat16       # MXU inputs; accumulation + epilogues in f32


def _round_up(x, m):
    return (x + m - 1) // m * m


def _pad2d(x, rows, cols, val=0.0):
    r, c = x.shape
    return jnp.pad(x, ((0, rows - r), (0, cols - c)), constant_values=val)


# ----------------------------- Pallas kernels -----------------------------

def _gemm_bias_kernel(p_ref, w_ref, b_ref, o_ref):
    """Row-tiled conv-as-GEMM + bias (no nonlinearity, no dummy operands)."""
    y = jnp.dot(p_ref[...], w_ref[...], preferred_element_type=jnp.float32)
    o_ref[...] = (y + b_ref[...]).astype(o_ref.dtype)


def _gemm_gdn_kernel(p_ref, w_ref, b_ref, g_ref, beta_ref, o_ref, *, inverse):
    """Row-tiled conv-as-GEMM + bias + GDN (rsqrt) / IGDN (sqrt) epilogue."""
    y = jnp.dot(p_ref[...], w_ref[...], preferred_element_type=jnp.float32)
    y = y + b_ref[...]
    nrm = beta_ref[...] + jnp.dot(y * y, g_ref[...],
                                  preferred_element_type=jnp.float32)
    if inverse:                       # IGDN: multiply by sqrt(norm)
        y = y * jnp.sqrt(nrm)
    else:                             # GDN: multiply by rsqrt(norm) -> EUP
        y = y * lax.rsqrt(nrm)
    o_ref[...] = y.astype(o_ref.dtype)


def _gemm_round_rate_kernel(p_ref, w_ref, b_ref, a_ref, cb_ref, m_ref,
                            q_ref, bits_ref, *, tile_p, n_rows):
    """Second analysis GEMM fused with quantization and rate accumulation."""
    i = pl.program_id(0)
    y = jnp.dot(p_ref[...], w_ref[...], preferred_element_type=jnp.float32)
    y = y + b_ref[...]
    q = jnp.round(y)                                   # eval path: torch.round
    q_ref[...] = q.astype(q_ref.dtype)

    a = a_ref[...]
    c = cb_ref[...]
    upper = jax.nn.sigmoid(a * (q + 0.5) + c)
    lower = jax.nn.sigmoid(a * (q - 0.5) + c)
    p = jnp.maximum(upper - lower, 1e-9)               # avoid -log2(0) = inf
    bits = -jnp.log2(p)
    row = i * tile_p + lax.broadcasted_iota(jnp.int32, bits.shape, 0)
    bits = jnp.where(row < n_rows, bits, 0.0) * m_ref[...]   # mask padded rows/lanes
    partial = jnp.sum(bits, axis=0, keepdims=True)           # (1, C_pad)

    @pl.when(i == 0)
    def _():
        bits_ref[...] = jnp.zeros_like(bits_ref)
    bits_ref[...] += partial                         # resident accumulator block


# --------------------------- pallas_call wrappers ---------------------------

def _prep(patches, w, b):
    P, K = patches.shape
    Kp = _round_up(K, LANE)
    Cp = _round_up(w.shape[1], LANE)
    tile_p = min(DEF_TILE_P, _round_up(P, 8))
    Pp = _round_up(P, tile_p)
    p_pad = _pad2d(patches, Pp, Kp).astype(MXU_DTYPE)
    w_pad = _pad2d(w, Kp, Cp).astype(MXU_DTYPE)
    b_pad = _pad2d(b, 1, Cp)
    return p_pad, w_pad, b_pad, tile_p, Pp, Kp, Cp


def conv_gemm(patches, w, b, gamma=None, beta=None, mode="none"):
    """Conv-as-GEMM (+bias, +GDN/IGDN), row-tiled with resident weights."""
    P = patches.shape[0]
    C = w.shape[1]
    p_pad, w_pad, b_pad, tile_p, Pp, Kp, Cp = _prep(patches, w, b)
    grid = (Pp // tile_p,)
    cparams = pltpu.CompilerParams(
        dimension_semantics=("parallel",), vmem_limit_bytes=VMEM_LIMIT)
    cost = pl.CostEstimate(
        flops=2 * Pp * Kp * Cp + (2 * Pp * Cp * Cp if mode != "none" else 0),
        transcendentals=Pp * Cp if mode != "none" else 0,
        bytes_accessed=p_pad.size * 2 + w_pad.size * 2 + Pp * Cp * 4)

    row_spec = pl.BlockSpec((tile_p, Kp), lambda i: (i, 0))
    out_spec = pl.BlockSpec((tile_p, Cp), lambda i: (i, 0))
    resident = lambda shape: pl.BlockSpec(shape, lambda i: (0, 0))

    if mode == "none":
        y = pl.pallas_call(
            _gemm_bias_kernel,
            out_shape=jax.ShapeDtypeStruct((Pp, Cp), jnp.float32),
            grid=grid,
            in_specs=[row_spec, resident((Kp, Cp)), resident((1, Cp))],
            out_specs=out_spec,
            compiler_params=cparams,
            cost_estimate=cost,
        )(p_pad, w_pad, b_pad)
    else:
        g_pad = _pad2d(gamma, Cp, Cp)
        beta_pad = _pad2d(beta, 1, Cp, val=1.0)   # keep rsqrt finite on padded lanes
        kern = functools.partial(_gemm_gdn_kernel, inverse=(mode == "igdn"))
        y = pl.pallas_call(
            kern,
            out_shape=jax.ShapeDtypeStruct((Pp, Cp), jnp.float32),
            grid=grid,
            in_specs=[row_spec, resident((Kp, Cp)), resident((1, Cp)),
                      resident((Cp, Cp)), resident((1, Cp))],
            out_specs=out_spec,
            compiler_params=cparams,
            cost_estimate=cost,
        )(p_pad, w_pad, b_pad, g_pad, beta_pad)
    return y[:P, :C]


def conv_round_rate(patches, w, b, cum_a, cum_b):
    """Second analysis conv fused with round() and rate partial sums."""
    P = patches.shape[0]
    C = w.shape[1]
    p_pad, w_pad, b_pad, tile_p, Pp, Kp, Cp = _prep(patches, w, b)
    a_pad = _pad2d(cum_a, 1, Cp)
    c_pad = _pad2d(cum_b, 1, Cp)
    mask = _pad2d(jnp.ones((1, C), jnp.float32), 1, Cp)
    grid = (Pp // tile_p,)
    kern = functools.partial(_gemm_round_rate_kernel, tile_p=tile_p, n_rows=P)
    cparams = pltpu.CompilerParams(
        dimension_semantics=("arbitrary",),    # rate block accumulates across tiles
        vmem_limit_bytes=VMEM_LIMIT)
    cost = pl.CostEstimate(
        flops=2 * Pp * Kp * Cp,
        transcendentals=3 * Pp * Cp,
        bytes_accessed=p_pad.size * 2 + w_pad.size * 2 + Pp * Cp * 4)

    resident = lambda shape: pl.BlockSpec(shape, lambda i: (0, 0))
    q, bits = pl.pallas_call(
        kern,
        out_shape=(jax.ShapeDtypeStruct((Pp, Cp), jnp.float32),
                   jax.ShapeDtypeStruct((1, Cp), jnp.float32)),
        grid=grid,
        in_specs=[pl.BlockSpec((tile_p, Kp), lambda i: (i, 0)),
                  resident((Kp, Cp)), resident((1, Cp)),
                  resident((1, Cp)), resident((1, Cp)), resident((1, Cp))],
        out_specs=(pl.BlockSpec((tile_p, Cp), lambda i: (i, 0)),
                   resident((1, Cp))),
        compiler_params=cparams,
        cost_estimate=cost,
    )(p_pad, w_pad, b_pad, a_pad, c_pad, mask)
    return q[:P, :C], jnp.sum(bits)


# ------------------------------- JAX glue ---------------------------------

def im2col(x_nhwc, k, stride, pad):
    """Patch extraction for the strided analysis convs (glue only)."""
    B, H, W, C = x_nhwc.shape
    xp = jnp.pad(x_nhwc, ((0, 0), (pad, pad), (pad, pad), (0, 0)))
    Ho = (H + 2 * pad - k) // stride + 1
    Wo = (W + 2 * pad - k) // stride + 1
    cols = []
    for ki in range(k):
        for kj in range(k):
            cols.append(
                xp[:, ki:ki + Ho * stride:stride, kj:kj + Wo * stride:stride, :])
    patches = jnp.concatenate(cols, axis=-1)
    return patches.reshape(B * Ho * Wo, k * k * C), (B, Ho, Wo)


# ConvT(k3, s2, p1, op1) as 4 zero-free phase convs on the original-resolution
# map.  phase (py, px) -> list of ((ky, kx) weight tap, (dy, dx) input shift),
# derived from the equivalent stride-1 conv on the zero-upsampled input.
_PHASE_TAPS = {
    (0, 0): [((1, 1), (0, 0))],
    (0, 1): [((1, 0), (0, 0)), ((1, 2), (0, 1))],
    (1, 0): [((0, 1), (0, 0)), ((2, 1), (1, 0))],
    (1, 1): [((0, 0), (0, 0)), ((0, 2), (0, 1)),
             ((2, 0), (1, 0)), ((2, 2), (1, 1))],
}


def conv_transpose_2x(x_nhwc, w, b, gamma=None, beta=None, mode="none", k=3):
    """Transposed conv (k=3, stride=2, pad=1, out_pad=1) via phase GEMMs."""
    B, H, W, Cin = x_nhwc.shape
    Cout = w.shape[1]
    xp = jnp.pad(x_nhwc, ((0, 0), (0, 1), (0, 1), (0, 0)))   # bottom/right halo
    w3 = w.reshape(k * k, Cin, Cout)
    phases = {}
    for (py, px), taps in _PHASE_TAPS.items():
        cols = [xp[:, dy:dy + H, dx:dx + W, :] for (_, (dy, dx)) in taps]
        patches = jnp.concatenate(cols, axis=-1).reshape(B * H * W,
                                                         len(taps) * Cin)
        wsel = jnp.concatenate([w3[ky * k + kx] for ((ky, kx), _) in taps],
                               axis=0)
        y = conv_gemm(patches, wsel, b, gamma, beta, mode=mode)
        phases[(py, px)] = y.reshape(B, H, W, Cout)
    out = jnp.stack([phases[(0, 0)], phases[(0, 1)],
                     phases[(1, 0)], phases[(1, 1)]], axis=-2)   # (B,H,W,4,C)
    out = out.reshape(B, H, W, 2, 2, Cout)
    out = jnp.transpose(out, (0, 1, 3, 2, 4, 5)).reshape(B, 2 * H, 2 * W, Cout)
    return out


def init_params(key, c_in=3, M=8, k=3):
    keys = jax.random.split(key, 4)

    def w(kk, shape, fan_in):
        return jax.random.normal(kk, shape, jnp.float32) / math.sqrt(fan_in)

    return {
        # Analysis
        "a1_w": w(keys[0], (k * k * c_in, M), k * k * c_in),
        "a1_b": jnp.zeros((1, M), jnp.float32),
        "a1_gamma": 0.1 * jnp.eye(M, dtype=jnp.float32),
        "a1_beta": jnp.ones((1, M), jnp.float32),
        "a2_w": w(keys[1], (k * k * M, M), k * k * M),
        "a2_b": jnp.zeros((1, M), jnp.float32),
        # Synthesis (weights laid out as the equivalent stride-1 conv on the
        # zero-upsampled input; the phase decomposition slices its taps)
        "s1_w": w(keys[2], (k * k * M, M), k * k * M),
        "s1_b": jnp.zeros((1, M), jnp.float32),
        "s1_gamma": 0.1 * jnp.eye(M, dtype=jnp.float32),
        "s1_beta": jnp.ones((1, M), jnp.float32),
        "s2_w": w(keys[3], (k * k * M, c_in), k * k * M),
        "s2_b": jnp.zeros((1, c_in), jnp.float32),
        # Culmulative(C): sigmoid(a * y + b), positive slope for a valid CDF
        "cum_a": jax.nn.softplus(jnp.ones((1, M), jnp.float32)),
        "cum_b": jnp.zeros((1, M), jnp.float32),
    }


def compress_and_decompress(x_nchw, params, k=3):
    B, C_in, H, W = x_nchw.shape
    M = params["a1_b"].shape[1]
    x = jnp.transpose(x_nchw, (0, 2, 3, 1)).astype(jnp.float32)   # NCHW -> NHWC

    # ---- Analysis: Conv(s2)+GDN -> Conv(s2) fused with round + rate ----
    p1, (_, h1, w1) = im2col(x, k=k, stride=2, pad=1)
    y1 = conv_gemm(p1, params["a1_w"], params["a1_b"],
                   params["a1_gamma"], params["a1_beta"], mode="gdn")
    y1 = y1.reshape(B, h1, w1, M)

    p2, (_, h2, w2) = im2col(y1, k=k, stride=2, pad=1)
    q2d, bit_sum = conv_round_rate(p2, params["a2_w"], params["a2_b"],
                                   params["cum_a"], params["cum_b"])
    q = q2d.reshape(B, h2, w2, M)

    # ---- Synthesis: ConvT(s2)+IGDN -> ConvT(s2) (zero-free phase GEMMs) ----
    s1 = conv_transpose_2x(q, params["s1_w"], params["s1_b"],
                           params["s1_gamma"], params["s1_beta"],
                           mode="igdn", k=k)
    x_hat = conv_transpose_2x(s1, params["s2_w"], params["s2_b"],
                              mode="none", k=k)
    x_hat = jnp.transpose(x_hat, (0, 3, 1, 2))                    # back to NCHW

    rate = bit_sum / (B * H * W)
    return x_hat, rate


# --------------------------------- main ------------------------------------

if __name__ == "__main__":
    key = jax.random.PRNGKey(0)
    kx, kp = jax.random.split(key)

    B, C, H, W = 2, 3, 16, 16
    X = jax.random.normal(kx, (B, C, H, W), jnp.float32)
    params = init_params(kp, c_in=C, M=8, k=3)

    fwd = jax.jit(compress_and_decompress)
    x_hat, rate = fwd(X, params)
    jax.block_until_ready((x_hat, rate))

    assert x_hat.shape == (B, C, H, W)
    assert x_hat.dtype == jnp.float32
    assert rate.shape == ()
    assert bool(jnp.isfinite(rate))
    assert bool(jnp.all(jnp.isfinite(x_hat)))
    print("KERNEL_OK")
</pallas_src>

<mosaic_0001>
module attributes {stable_mosaic.version = 11 : i64} {
  func.func @_gemm_gdn_kernel(%arg0: i32, %arg1: memref<128x128xbf16, #tpu.memory_space<vmem>>, %arg2: memref<128x128xbf16, #tpu.memory_space<vmem>>, %arg3: memref<1x128xf32, #tpu.memory_space<vmem>>, %arg4: memref<128x128xf32, #tpu.memory_space<vmem>>, %arg5: memref<1x128xf32, #tpu.memory_space<vmem>>, %arg6: memref<128x128xf32, #tpu.memory_space<vmem>>) attributes {dimension_semantics = [#tpu.dimension_semantics<parallel>], iteration_bounds = array<i64: 1>, scalar_prefetch = 0 : i64, scratch_operands = 0 : i64, tpu.core_type = #tpu.core_type<tc>, window_params = [{transform_indices = @transform_0, window_bounds = array<i64: 128, 128>}, {pipeline_mode = #tpu.pipeline_mode<synchronous>, transform_indices = @transform_1, window_bounds = array<i64: 128, 128>}, {pipeline_mode = #tpu.pipeline_mode<synchronous>, transform_indices = @transform_2, window_bounds = array<i64: 1, 128>}, {pipeline_mode = #tpu.pipeline_mode<synchronous>, transform_indices = @transform_3, window_bounds = array<i64: 128, 128>}, {pipeline_mode = #tpu.pipeline_mode<synchronous>, transform_indices = @transform_4, window_bounds = array<i64: 1, 128>}, {transform_indices = @transform_5, window_bounds = array<i64: 128, 128>}]} {
    %c0 = arith.constant 0 : index
    %c0_0 = arith.constant 0 : index
    %0 = vector.load %arg1[%c0, %c0_0] : memref<128x128xbf16, #tpu.memory_space<vmem>>, vector<128x128xbf16>
    %c0_1 = arith.constant 0 : index
    %c0_2 = arith.constant 0 : index
    %1 = vector.load %arg2[%c0_1, %c0_2] : memref<128x128xbf16, #tpu.memory_space<vmem>>, vector<128x128xbf16>
    %cst = arith.constant dense<0.000000e+00> : vector<128x128xf32>
    %2 = tpu.matmul %0, %1, %cst {dimension_numbers = #tpu.dot_dimension_numbers<[1], [0], [0], [1], [0, 0, 1, 1], [], []>} : vector<128x128xbf16>, vector<128x128xbf16>, vector<128x128xf32> -> vector<128x128xf32>
    %c0_3 = arith.constant 0 : index
    %c0_4 = arith.constant 0 : index
    %3 = vector.load %arg3[%c0_3, %c0_4] : memref<1x128xf32, #tpu.memory_space<vmem>>, vector<1x128xf32>
    %4 = vector.broadcast %3 : vector<1x128xf32> to vector<128x128xf32>
    %5 = arith.addf %2, %4 : vector<128x128xf32>
    %c0_5 = arith.constant 0 : index
    %c0_6 = arith.constant 0 : index
    %6 = vector.load %arg5[%c0_5, %c0_6] : memref<1x128xf32, #tpu.memory_space<vmem>>, vector<1x128xf32>
    %7 = arith.mulf %5, %5 : vector<128x128xf32>
    %c0_7 = arith.constant 0 : index
    %c0_8 = arith.constant 0 : index
    %8 = vector.load %arg4[%c0_7, %c0_8] : memref<128x128xf32, #tpu.memory_space<vmem>>, vector<128x128xf32>
    %cst_9 = arith.constant dense<0.000000e+00> : vector<128x128xf32>
    %9 = tpu.matmul %7, %8, %cst_9 {dimension_numbers = #tpu.dot_dimension_numbers<[1], [0], [0], [1], [0, 0, 1, 1], [], []>} : vector<128x128xf32>, vector<128x128xf32>, vector<128x128xf32> -> vector<128x128xf32>
    %10 = vector.broadcast %6 : vector<1x128xf32> to vector<128x128xf32>
    %11 = arith.addf %10, %9 : vector<128x128xf32>
    %12 = math.rsqrt %11 : vector<128x128xf32>
    %13 = arith.mulf %5, %12 : vector<128x128xf32>
    %c0_10 = arith.constant 0 : index
    %c0_11 = arith.constant 0 : index
    %14 = vector.load %arg6[%c0_10, %c0_11] : memref<128x128xf32, #tpu.memory_space<vmem>>, vector<128x128xf32>
    tpu.vector_store %arg6[%c0_10, %c0_11], %13 {strides = array<i32>} : memref<128x128xf32, #tpu.memory_space<vmem>>, vector<128x128xf32>,
    return
  }
  func.func @transform_0(%arg0: i32) -> (i32, i32) {
    %c0_i32 = arith.constant 0 : i32
    %c0_i32_0 = arith.constant 0 : i32
    return %arg0, %c0_i32 : i32, i32
  }
  func.func @transform_1(%arg0: i32) -> (i32, i32) {
    %c0_i32 = arith.constant 0 : i32
    %c0_i32_0 = arith.constant 0 : i32
    %c0_i32_1 = arith.constant 0 : i32
    return %c0_i32, %c0_i32_0 : i32, i32
  }
  func.func @transform_2(%arg0: i32) -> (i32, i32) {
    %c0_i32 = arith.constant 0 : i32
    %c0_i32_0 = arith.constant 0 : i32
    %c0_i32_1 = arith.constant 0 : i32
    return %c0_i32, %c0_i32_0 : i32, i32
  }
  func.func @transform_3(%arg0: i32) -> (i32, i32) {
    %c0_i32 = arith.constant 0 : i32
    %c0_i32_0 = arith.constant 0 : i32
    %c0_i32_1 = arith.constant 0 : i32
    return %c0_i32, %c0_i32_0 : i32, i32
  }
  func.func @transform_4(%arg0: i32) -> (i32, i32) {
    %c0_i32 = arith.constant 0 : i32
    %c0_i32_0 = arith.constant 0 : i32
    %c0_i32_1 = arith.constant 0 : i32
    return %c0_i32, %c0_i32_0 : i32, i32
  }
  func.func @transform_5(%arg0: i32) -> (i32, i32) {
    %c0_i32 = arith.constant 0 : i32
    %c0_i32_0 = arith.constant 0 : i32
    return %arg0, %c0_i32 : i32, i32
  }
}

module attributes {stable_mosaic.version = 11 : i64} {
  func.func @_gemm_round_rate_kernel(%arg0: i32, %arg1: memref<32x128xbf16, #tpu.memory_space<vmem>>, %arg2: memref<128x128xbf16, #tpu.memory_space<vmem>>, %arg3: memref<1x128xf32, #tpu.memory_space<vmem>>, %arg4: memref<1x128xf32, #tpu.memory_space<vmem>>, %arg5: memref<1x128xf32, #tpu.memory_space<vmem>>, %arg6: memref<1x128xf32, #tpu.memory_space<vmem>>, %arg7: memref<32x128xf32, #tpu.memory_space<vmem>>, %arg8: memref<1x128xf32, #tpu.memory_space<vmem>>) attributes {dimension_semantics = [#tpu.dimension_semantics<arbitrary>], iteration_bounds = array<i64: 1>, scalar_prefetch = 0 : i64, scratch_operands = 0 : i64, tpu.core_type = #tpu.core_type<tc>, window_params = [{transform_indices = @transform_0, window_bounds = array<i64: 32, 128>}, {pipeline_mode = #tpu.pipeline_mode<synchronous>, transform_indices = @transform_1, window_bounds = array<i64: 128, 128>}, {pipeline_mode = #tpu.pipeline_mode<synchronous>, transform_indices = @transform_2, window_bounds = array<i64: 1, 128>}, {pipeline_mode = #tpu.pipeline_mode<synchronous>, transform_indices = @transform_3, window_bounds = array<i64: 1, 128>}, {pipeline_mode = #tpu.pipeline_mode<synchronous>, transform_indices = @transform_4, window_bounds = array<i64: 1, 128>}, {pipeline_mode = #tpu.pipeline_mode<synchronous>, transform_indices = @transform_5, window_bounds = array<i64: 1, 128>}, {transform_indices = @transform_6, window_bounds = array<i64: 32, 128>}, {pipeline_mode = #tpu.pipeline_mode<synchronous>, transform_indices = @transform_7, window_bounds = array<i64: 1, 128>}]} {
    %c0 = arith.constant 0 : index
    %c0_0 = arith.constant 0 : index
    %0 = vector.load %arg1[%c0, %c0_0] : memref<32x128xbf16, #tpu.memory_space<vmem>>, vector<32x128xbf16>
    %c0_1 = arith.constant 0 : index
    %c0_2 = arith.constant 0 : index
    %1 = vector.load %arg2[%c0_1, %c0_2] : memref<128x128xbf16, #tpu.memory_space<vmem>>, vector<128x128xbf16>
    %cst = arith.constant dense<0.000000e+00> : vector<32x128xf32>
    %2 = tpu.matmul %0, %1, %cst {dimension_numbers = #tpu.dot_dimension_numbers<[1], [0], [0], [1], [0, 0, 1, 1], [], []>} : vector<32x128xbf16>, vector<128x128xbf16>, vector<32x128xf32> -> vector<32x128xf32>
    %c0_3 = arith.constant 0 : index
    %c0_4 = arith.constant 0 : index
    %3 = vector.load %arg3[%c0_3, %c0_4] : memref<1x128xf32, #tpu.memory_space<vmem>>, vector<1x128xf32>
    %4 = vector.broadcast %3 : vector<1x128xf32> to vector<32x128xf32>
    %5 = arith.addf %2, %4 : vector<32x128xf32>
    %6 = math.roundeven %5 : vector<32x128xf32>
    %c0_5 = arith.constant 0 : index
    %c0_6 = arith.constant 0 : index
    %7 = vector.load %arg7[%c0_5, %c0_6] : memref<32x128xf32, #tpu.memory_space<vmem>>, vector<32x128xf32>
    tpu.vector_store %arg7[%c0_5, %c0_6], %6 {strides = array<i32>} : memref<32x128xf32, #tpu.memory_space<vmem>>, vector<32x128xf32>,
    %c0_7 = arith.constant 0 : index
    %c0_8 = arith.constant 0 : index
    %8 = vector.load %arg4[%c0_7, %c0_8] : memref<1x128xf32, #tpu.memory_space<vmem>>, vector<1x128xf32>
    %c0_9 = arith.constant 0 : index
    %c0_10 = arith.constant 0 : index
    %9 = vector.load %arg5[%c0_9, %c0_10] : memref<1x128xf32, #tpu.memory_space<vmem>>, vector<1x128xf32>
    %cst_11 = arith.constant 5.000000e-01 : f32
    %10 = vector.broadcast %cst_11 : f32 to vector<32x128xf32>
    %11 = arith.addf %6, %10 : vector<32x128xf32>
    %12 = vector.broadcast %8 : vector<1x128xf32> to vector<32x128xf32>
    %13 = arith.mulf %12, %11 : vector<32x128xf32>
    %14 = vector.broadcast %9 : vector<1x128xf32> to vector<32x128xf32>
    %15 = arith.addf %13, %14 : vector<32x128xf32>
    %16 = arith.negf %15 : vector<32x128xf32>
    %17 = math.exp %16 : vector<32x128xf32>
    %cst_12 = arith.constant 1.000000e+00 : f32
    %18 = vector.broadcast %cst_12 : f32 to vector<32x128xf32>
    %19 = arith.addf %18, %17 : vector<32x128xf32>
    %20 = arith.divf %18, %19 : vector<32x128xf32>
    %cst_13 = arith.constant 5.000000e-01 : f32
    %21 = vector.broadcast %cst_13 : f32 to vector<32x128xf32>
    %22 = arith.subf %6, %21 : vector<32x128xf32>
    %23 = vector.broadcast %8 : vector<1x128xf32> to vector<32x128xf32>
    %24 = arith.mulf %23, %22 : vector<32x128xf32>
    %25 = vector.broadcast %9 : vector<1x128xf32> to vector<32x128xf32>
    %26 = arith.addf %24, %25 : vector<32x128xf32>
    %27 = arith.negf %26 : vector<32x128xf32>
    %28 = math.exp %27 : vector<32x128xf32>
    %cst_14 = arith.constant 1.000000e+00 : f32
    %29 = vector.broadcast %cst_14 : f32 to vector<32x128xf32>
    %30 = arith.addf %29, %28 : vector<32x128xf32>
    %31 = arith.divf %29, %30 : vector<32x128xf32>
    %32 = arith.subf %20, %31 : vector<32x128xf32>
    %cst_15 = arith.constant 9.99999971E-10 : f32
    %33 = vector.broadcast %cst_15 : f32 to vector<32x128xf32>
    %34 = arith.maximumf %32, %33 : vector<32x128xf32>
    %35 = math.log %34 : vector<32x128xf32>
    %cst_16 = arith.constant 2.000000e+00 : f32
    %36 = math.log %cst_16 : f32
    %37 = vector.broadcast %36 : f32 to vector<32x128xf32>
    %38 = arith.divf %35, %37 : vector<32x128xf32>
    %cst_17 = arith.constant 0.000000e+00 : f32
    %39 = vector.broadcast %cst_17 : f32 to vector<32x128xf32>
    %40 = arith.subf %39, %38 : vector<32x128xf32>
    %c32_i32 = arith.constant 32 : i32
    %41 = arith.muli %arg0, %c32_i32 : i32
    %42 = tpu.iota {dimensions = array<i32: 0>} : vector<32x128xi32>
    %43 = vector.broadcast %41 : i32 to vector<32x128xi32>
    %44 = arith.addi %43, %42 : vector<32x128xi32>
    %c32_i32_18 = arith.constant 32 : i32
    %45 = vector.broadcast %c32_i32_18 : i32 to vector<32x128xi32>
    %46 = arith.cmpi slt, %44, %45 : vector<32x128xi32>
    %cst_19 = arith.constant 0.000000e+00 : f32
    %47 = vector.broadcast %cst_19 : f32 to vector<32x128xf32>
    %48 = arith.select %46, %40, %47 : vector<32x128xi1>, vector<32x128xf32>
    %c0_20 = arith.constant 0 : index
    %c0_21 = arith.constant 0 : index
    %49 = vector.load %arg6[%c0_20, %c0_21] : memref<1x128xf32, #tpu.memory_space<vmem>>, vector<1x128xf32>
    %50 = vector.broadcast %49 : vector<1x128xf32> to vector<32x128xf32>
    %51 = arith.mulf %48, %50 : vector<32x128xf32>
    %cst_22 = arith.constant dense<0.000000e+00> : vector<128xf32>
    %52 = vector.multi_reduction <add>, %51, %cst_22 [0] : vector<32x128xf32> to vector<128xf32>
    %53 = vector.shape_cast %52 : vector<128xf32> to vector<1x128xf32>
    %c0_i32 = arith.constant 0 : i32
    %54 = arith.cmpi eq, %arg0, %c0_i32 : i32
    %55 = arith.extui %54 : i1 to i32
    %c0_i32_23 = arith.constant 0 : i32
    %56 = arith.cmpi ne, %55, %c0_i32_23 : i32
    scf.if %56 {
      %cst_28 = arith.constant 0.000000e+00 : f32
      %60 = vector.broadcast %cst_28 : f32 to vector<1x128xf32>
      %c0_29 = arith.constant 0 : index
      %c0_30 = arith.constant 0 : index
      %61 = vector.load %arg8[%c0_29, %c0_30] : memref<1x128xf32, #tpu.memory_space<vmem>>, vector<1x128xf32>
      tpu.vector_store %arg8[%c0_29, %c0_30], %60 {strides = array<i32>} : memref<1x128xf32, #tpu.memory_space<vmem>>, vector<1x128xf32>,
    } else {
    }
    %c0_24 = arith.constant 0 : index
    %c0_25 = arith.constant 0 : index
    %57 = vector.load %arg8[%c0_24, %c0_25] : memref<1x128xf32, #tpu.memory_space<vmem>>, vector<1x128xf32>
    %58 = arith.addf %57, %53 : vector<1x128xf32>
    %c0_26 = arith.constant 0 : index
    %c0_27 = arith.constant 0 : index
    %59 = vector.load %arg8[%c0_26, %c0_27] : memref<1x128xf32, #tpu.memory_space<vmem>>, vector<1x128xf32>
    tpu.vector_store %arg8[%c0_26, %c0_27], %58 {strides = array<i32>} : memref<1x128xf32, #tpu.memory_space<vmem>>, vector<1x128xf32>,
    return
  }
  func.func @transform_0(%arg0: i32) -> (i32, i32) {
    %c0_i32 = arith.constant 0 : i32
    %c0_i32_0 = arith.constant 0 : i32
    return %arg0, %c0_i32 : i32, i32
  }
  func.func @transform_1(%arg0: i32) -> (i32, i32) {
    %c0_i32 = arith.constant 0 : i32
    %c0_i32_0 = arith.constant 0 : i32
    %c0_i32_1 = arith.constant 0 : i32
    return %c0_i32, %c0_i32_0 : i32, i32
  }
  func.func @transform_2(%arg0: i32) -> (i32, i32) {
    %c0_i32 = arith.constant 0 : i32
    %c0_i32_0 = arith.constant 0 : i32
    %c0_i32_1 = arith.constant 0 : i32
    return %c0_i32, %c0_i32_0 : i32, i32
  }
  func.func @transform_3(%arg0: i32) -> (i32, i32) {
    %c0_i32 = arith.constant 0 : i32
    %c0_i32_0 = arith.constant 0 : i32
    %c0_i32_1 = arith.constant 0 : i32
    return %c0_i32, %c0_i32_0 : i32, i32
  }
  func.func @transform_4(%arg0: i32) -> (i32, i32) {
    %c0_i32 = arith.constant 0 : i32
    %c0_i32_0 = arith.constant 0 : i32
    %c0_i32_1 = arith.constant 0 : i32
    return %c0_i32, %c0_i32_0 : i32, i32
  }
  func.func @transform_5(%arg0: i32) -> (i32, i32) {
    %c0_i32 = arith.constant 0 : i32
    %c0_i32_0 = arith.constant 0 : i32
    %c0_i32_1 = arith.constant 0 : i32
    return %c0_i32, %c0_i32_0 : i32, i32
  }
  func.func @transform_6(%arg0: i32) -> (i32, i32) {
    %c0_i32 = arith.constant 0 : i32
    %c0_i32_0 = arith.constant 0 : i32
    return %arg0, %c0_i32 : i32, i32
  }
  func.func @transform_7(%arg0: i32) -> (i32, i32) {
    %c0_i32 = arith.constant 0 : i32
    %c0_i32_0 = arith.constant 0 : i32
    %c0_i32_1 = arith.constant 0 : i32
    return %c0_i32, %c0_i32_0 : i32, i32
  }
}

module attributes {stable_mosaic.version = 11 : i64} {
  func.func @_gemm_gdn_kernel(%arg0: i32, %arg1: memref<32x128xbf16, #tpu.memory_space<vmem>>, %arg2: memref<128x128xbf16, #tpu.memory_space<vmem>>, %arg3: memref<1x128xf32, #tpu.memory_space<vmem>>, %arg4: memref<128x128xf32, #tpu.memory_space<vmem>>, %arg5: memref<1x128xf32, #tpu.memory_space<vmem>>, %arg6: memref<32x128xf32, #tpu.memory_space<vmem>>) attributes {dimension_semantics = [#tpu.dimension_semantics<parallel>], iteration_bounds = array<i64: 1>, scalar_prefetch = 0 : i64, scratch_operands = 0 : i64, tpu.core_type = #tpu.core_type<tc>, window_params = [{transform_indices = @transform_0, window_bounds = array<i64: 32, 128>}, {pipeline_mode = #tpu.pipeline_mode<synchronous>, transform_indices = @transform_1, window_bounds = array<i64: 128, 128>}, {pipeline_mode = #tpu.pipeline_mode<synchronous>, transform_indices = @transform_2, window_bounds = array<i64: 1, 128>}, {pipeline_mode = #tpu.pipeline_mode<synchronous>, transform_indices = @transform_3, window_bounds = array<i64: 128, 128>}, {pipeline_mode = #tpu.pipeline_mode<synchronous>, transform_indices = @transform_4, window_bounds = array<i64: 1, 128>}, {transform_indices = @transform_5, window_bounds = array<i64: 32, 128>}]} {
    %c0 = arith.constant 0 : index
    %c0_0 = arith.constant 0 : index
    %0 = vector.load %arg1[%c0, %c0_0] : memref<32x128xbf16, #tpu.memory_space<vmem>>, vector<32x128xbf16>
    %c0_1 = arith.constant 0 : index
    %c0_2 = arith.constant 0 : index
    %1 = vector.load %arg2[%c0_1, %c0_2] : memref<128x128xbf16, #tpu.memory_space<vmem>>, vector<128x128xbf16>
    %cst = arith.constant dense<0.000000e+00> : vector<32x128xf32>
    %2 = tpu.matmul %0, %1, %cst {dimension_numbers = #tpu.dot_dimension_numbers<[1], [0], [0], [1], [0, 0, 1, 1], [], []>} : vector<32x128xbf16>, vector<128x128xbf16>, vector<32x128xf32> -> vector<32x128xf32>
    %c0_3 = arith.constant 0 : index
    %c0_4 = arith.constant 0 : index
    %3 = vector.load %arg3[%c0_3, %c0_4] : memref<1x128xf32, #tpu.memory_space<vmem>>, vector<1x128xf32>
    %4 = vector.broadcast %3 : vector<1x128xf32> to vector<32x128xf32>
    %5 = arith.addf %2, %4 : vector<32x128xf32>
    %c0_5 = arith.constant 0 : index
    %c0_6 = arith.constant 0 : index
    %6 = vector.load %arg5[%c0_5, %c0_6] : memref<1x128xf32, #tpu.memory_space<vmem>>, vector<1x128xf32>
    %7 = arith.mulf %5, %5 : vector<32x128xf32>
    %c0_7 = arith.constant 0 : index
    %c0_8 = arith.constant 0 : index
    %8 = vector.load %arg4[%c0_7, %c0_8] : memref<128x128xf32, #tpu.memory_space<vmem>>, vector<128x128xf32>
    %cst_9 = arith.constant dense<0.000000e+00> : vector<32x128xf32>
    %9 = tpu.matmul %7, %8, %cst_9 {dimension_numbers = #tpu.dot_dimension_numbers<[1], [0], [0], [1], [0, 0, 1, 1], [], []>} : vector<32x128xf32>, vector<128x128xf32>, vector<32x128xf32> -> vector<32x128xf32>
    %10 = vector.broadcast %6 : vector<1x128xf32> to vector<32x128xf32>
    %11 = arith.addf %10, %9 : vector<32x128xf32>
    %12 = math.sqrt %11 : vector<32x128xf32>
    %13 = arith.mulf %5, %12 : vector<32x128xf32>
    %c0_10 = arith.constant 0 : index
    %c0_11 = arith.constant 0 : index
    %14 = vector.load %arg6[%c0_10, %c0_11] : memref<32x128xf32, #tpu.memory_space<vmem>>, vector<32x128xf32>
    tpu.vector_store %arg6[%c0_10, %c0_11], %13 {strides = array<i32>} : memref<32x128xf32, #tpu.memory_space<vmem>>, vector<32x128xf32>,
    return
  }
  func.func @transform_0(%arg0: i32) -> (i32, i32) {
    %c0_i32 = arith.constant 0 : i32
    %c0_i32_0 = arith.constant 0 : i32
    return %arg0, %c0_i32 : i32, i32
  }
  func.func @transform_1(%arg0: i32) -> (i32, i32) {
    %c0_i32 = arith.constant 0 : i32
    %c0_i32_0 = arith.constant 0 : i32
    %c0_i32_1 = arith.constant 0 : i32
    return %c0_i32, %c0_i32_0 : i32, i32
  }
  func.func @transform_2(%arg0: i32) -> (i32, i32) {
    %c0_i32 = arith.constant 0 : i32
    %c0_i32_0 = arith.constant 0 : i32
    %c0_i32_1 = arith.constant 0 : i32
    return %c0_i32, %c0_i32_0 : i32, i32
  }
  func.func @transform_3(%arg0: i32) -> (i32, i32) {
    %c0_i32 = arith.constant 0 : i32
    %c0_i32_0 = arith.constant 0 : i32
    %c0_i32_1 = arith.constant 0 : i32
    return %c0_i32, %c0_i32_0 : i32, i32
  }
  func.func @transform_4(%arg0: i32) -> (i32, i32) {
    %c0_i32 = arith.constant 0 : i32
    %c0_i32_0 = arith.constant 0 : i32
    %c0_i32_1 = arith.constant 0 : i32
    return %c0_i32, %c0_i32_0 : i32, i32
  }
  func.func @transform_5(%arg0: i32) -> (i32, i32) {
    %c0_i32 = arith.constant 0 : i32
    %c0_i32_0 = arith.constant 0 : i32
    return %arg0, %c0_i32 : i32, i32
  }
}

module attributes {stable_mosaic.version = 11 : i64} {
  func.func @_gemm_bias_kernel(%arg0: i32, %arg1: memref<128x128xbf16, #tpu.memory_space<vmem>>, %arg2: memref<128x128xbf16, #tpu.memory_space<vmem>>, %arg3: memref<1x128xf32, #tpu.memory_space<vmem>>, %arg4: memref<128x128xf32, #tpu.memory_space<vmem>>) attributes {dimension_semantics = [#tpu.dimension_semantics<parallel>], iteration_bounds = array<i64: 1>, scalar_prefetch = 0 : i64, scratch_operands = 0 : i64, tpu.core_type = #tpu.core_type<tc>, window_params = [{transform_indices = @transform_0, window_bounds = array<i64: 128, 128>}, {pipeline_mode = #tpu.pipeline_mode<synchronous>, transform_indices = @transform_1, window_bounds = array<i64: 128, 128>}, {pipeline_mode = #tpu.pipeline_mode<synchronous>, transform_indices = @transform_2, window_bounds = array<i64: 1, 128>}, {transform_indices = @transform_3, window_bounds = array<i64: 128, 128>}]} {
    %c0 = arith.constant 0 : index
    %c0_0 = arith.constant 0 : index
    %0 = vector.load %arg1[%c0, %c0_0] : memref<128x128xbf16, #tpu.memory_space<vmem>>, vector<128x128xbf16>
    %c0_1 = arith.constant 0 : index
    %c0_2 = arith.constant 0 : index
    %1 = vector.load %arg2[%c0_1, %c0_2] : memref<128x128xbf16, #tpu.memory_space<vmem>>, vector<128x128xbf16>
    %cst = arith.constant dense<0.000000e+00> : vector<128x128xf32>
    %2 = tpu.matmul %0, %1, %cst {dimension_numbers = #tpu.dot_dimension_numbers<[1], [0], [0], [1], [0, 0, 1, 1], [], []>} : vector<128x128xbf16>, vector<128x128xbf16>, vector<128x128xf32> -> vector<128x128xf32>
    %c0_3 = arith.constant 0 : index
    %c0_4 = arith.constant 0 : index
    %3 = vector.load %arg3[%c0_3, %c0_4] : memref<1x128xf32, #tpu.memory_space<vmem>>, vector<1x128xf32>
    %4 = vector.broadcast %3 : vector<1x128xf32> to vector<128x128xf32>
    %5 = arith.addf %2, %4 : vector<128x128xf32>
    %c0_5 = arith.constant 0 : index
    %c0_6 = arith.constant 0 : index
    %6 = vector.load %arg4[%c0_5, %c0_6] : memref<128x128xf32, #tpu.memory_space<vmem>>, vector<128x128xf32>
    tpu.vector_store %arg4[%c0_5, %c0_6], %5 {strides = array<i32>} : memref<128x128xf32, #tpu.memory_space<vmem>>, vector<128x128xf32>,
    return
  }
  func.func @transform_0(%arg0: i32) -> (i32, i32) {
    %c0_i32 = arith.constant 0 : i32
    %c0_i32_0 = arith.constant 0 : i32
    return %arg0, %c0_i32 : i32, i32
  }
  func.func @transform_1(%arg0: i32) -> (i32, i32) {
    %c0_i32 = arith.constant 0 : i32
    %c0_i32_0 = arith.constant 0 : i32
    %c0_i32_1 = arith.constant 0 : i32
    return %c0_i32, %c0_i32_0 : i32, i32
  }
  func.func @transform_2(%arg0: i32) -> (i32, i32) {
    %c0_i32 = arith.constant 0 : i32
    %c0_i32_0 = arith.constant 0 : i32
    %c0_i32_1 = arith.constant 0 : i32
    return %c0_i32, %c0_i32_0 : i32, i32
  }
  func.func @transform_3(%arg0: i32) -> (i32, i32) {
    %c0_i32 = arith.constant 0 : i32
    %c0_i32_0 = arith.constant 0 : i32
    return %arg0, %c0_i32 : i32, i32
  }
}

</mosaic_0001>

<bundles_post_ra>
// kernel: compress_and_decompress.10
= control target key start
LH: loop header
LB: loop body
LE: loop exit
PB: predicated region body
PF: predicated region fallthrough
CT: control target
= control target key end

     0   :  { %s1017_s1 = inlined_call_operand.vmem [shape: bf16[128,128], index: 1, kind: input, shape index: {}]   ;;  %s1018_s0 = inlined_call_operand.vmem [shape: bf16[128,128], index: 0, kind: input, shape index: {}]   ;;  %s1019_s3 = inlined_call_operand.vmem [shape: f32[128,128], index: 3, kind: input, shape index: {}]   ;;  %s1020_s2 = inlined_call_operand.vmem [shape: f32[1,128], index: 2, kind: input, shape index: {}]   ;;  %s1021_s4 = inlined_call_operand.vmem [shape: f32[1,128], index: 4, kind: input, shape index: {}]   ;;  %s1022_s5 = inlined_call_operand.vmem [shape: f32[128,128], index: 5, kind: output, shape index: {}]  }
   0x1   :  { %v691_v0 = vld [vmem:[%s1017_s1] sm:$0xff]   ;;  %v692_v1 = vld [vmem:[%s1017_s1 + $0x8] sm:$0xff]   ;;  %v693_v2 = vld [vmem:[%s1017_s1 + $0x10] sm:$0xff]  }
   0x2   :  { %571 = vmatprep.subr.bf16.mxu0 %v691_v0  ;;  %v694_v3 = vld [vmem:[%s1017_s1 + $0x18] sm:$0xff]   ;;  %v699_v4 = vld [vmem:[%s1018_s0] sm:$0xff]   ;;  %v696_v6 = vld [vmem:[%s1017_s1 + $0x28] sm:$0xff]  }
   0x3   :  { %572 = vmatpush3.bf16.msra.mxu0 %v691_v0  ;;  %587 = vmatprep.mubr.bf16.mxu0 %v699_v4  ;;  %v695_v5 = vld [vmem:[%s1017_s1 + $0x20] sm:$0xff]   ;;  %v271_v8 = vld [vmem:[%s1019_s3 + $0x8] sm:$0xff]  ;;  %v272_v9 = vld [vmem:[%s1019_s3 + $0x10] sm:$0xff] }
   0x4   :  { %573 = vmatprep.subr.bf16.mxu0 %v692_v1  ;;  %v270_v7 = vld [vmem:[%s1019_s3] sm:$0xff]  ;;  %v273_v11 = vld [vmem:[%s1019_s3 + $0x18] sm:$0xff]  ;;  %v275_v14 = vld [vmem:[%s1019_s3 + $0x28] sm:$0xff] }
   0x5   :  { %v659_v10 = vpack.c.bf16 %v271_v8, %v270_v7  ;;  %v663_v12 = vpack.c.bf16 %v273_v11, %v272_v9  ;;  %v274_v13 = vld [vmem:[%s1019_s3 + $0x20] sm:$0xff]  ;;  %v697_v15 = vld [vmem:[%s1017_s1 + $0x30] sm:$0xff]   ;;  %v277_v18 = vld [vmem:[%s1019_s3 + $0x38] sm:$0xff] }
   0x6   :  { %v667_v16 = vpack.c.bf16 %v275_v14, %v274_v13  ;;  %v276_v17 = vld [vmem:[%s1019_s3 + $0x30] sm:$0xff]  ;;  %v698_v19 = vld [vmem:[%s1017_s1 + $0x38] sm:$0xff]   ;;  %v278_v21 = vld [vmem:[%s1019_s3 + $0x40] sm:$0xff] }
   0x7   :  { %574 = vmatpush3.bf16.msra.mxu0 %v692_v1  ;;  %660 = vmatprep.subr.bf16.mxu1 %v659_v10  ;;  %v671_v20 = vpack.c.bf16 %v277_v18, %v276_v17  ;;  %v279_v22 = vld [vmem:[%s1019_s3 + $0x48] sm:$0xff]  ;;  %v280_v25 = vld [vmem:[%s1019_s3 + $0x50] sm:$0xff]  ;;  %v281_v26 = vld [vmem:[%s1019_s3 + $0x58] sm:$0xff] }
   0x8   :  { %575 = vmatprep.subr.bf16.mxu0 %v693_v2  ;;  %662 = vmatpush3.bf16.msra.mxu1 %v659_v10  ;;  %v675_v23 = vpack.c.bf16 %v279_v22, %v278_v21  ;;  %v700_v24 = vld [vmem:[%s1018_s0 + $0x8] sm:$0xff]   ;;  %v701_v27 = vld [vmem:[%s1018_s0 + $0x10] sm:$0xff]   ;;  %v679_v28 = vpack.c.bf16 %v281_v26, %v280_v25  ;;  %v702_v29 = vld [vmem:[%s1018_s0 + $0x18] sm:$0xff]  }
   0x9   :  { %664 = vmatprep.subr.bf16.mxu1 %v663_v12  ;;  %v703_v30 = vld [vmem:[%s1018_s0 + $0x20] sm:$0xff]   ;;  %v704_v31 = vld [vmem:[%s1018_s0 + $0x28] sm:$0xff]   ;;  %v705_v32 = vld [vmem:[%s1018_s0 + $0x30] sm:$0xff]  }
   0xa   :  { %v706_v33 = vld [vmem:[%s1018_s0 + $0x38] sm:$0xff]   ;;  %v282_v34 = vld [vmem:[%s1019_s3 + $0x60] sm:$0xff]  ;;  %v283_v35 = vld [vmem:[%s1019_s3 + $0x68] sm:$0xff] }
   0xb   :  { %576 = vmatpush3.bf16.msra.mxu0 %v693_v2  ;;  %v683_v36 = vpack.c.bf16 %v283_v35, %v282_v34  ;;  %v284_v37 = vld [vmem:[%s1019_s3 + $0x70] sm:$0xff]  ;;  %v285_v38 = vld [vmem:[%s1019_s3 + $0x78] sm:$0xff]  ;;  %v505_v40 = vld [vmem:[%s1020_s2] ss:$0 sm:$0xff] }
   0xc   :  { %577 = vmatprep.subr.bf16.mxu0 %v694_v3  ;;  %666 = vmatpush3.bf16.msra.mxu1 %v663_v12  ;;  %v687_v39 = vpack.c.bf16 %v285_v38, %v284_v37  ;;  %v935_v25 = vld [vmem:[%s1021_s4] ss:$0 sm:$0xff] }
   0xd   :  { %668 = vmatprep.subr.bf16.mxu1 %v667_v16 }
   0xf   :  { %578 = vmatpush3.bf16.msra.mxu0 %v694_v3 }
  0x10   :  { %579 = vmatprep.subr.bf16.mxu0 %v695_v5  ;;  %670 = vmatpush3.bf16.msra.mxu1 %v667_v16 }
  0x11   :  { %672 = vmatprep.subr.bf16.mxu1 %v671_v20 }
  0x13   :  { %580 = vmatpush3.bf16.msra.mxu0 %v695_v5 }
  0x14   :  { %581 = vmatprep.subr.bf16.mxu0 %v696_v6  ;;  %674 = vmatpush3.bf16.msra.mxu1 %v671_v20 }
  0x15   :  { %676 = vmatprep.subr.bf16.mxu1 %v675_v23 }
  0x17   :  { %582 = vmatpush3.bf16.msra.mxu0 %v696_v6 }
  0x18   :  { %583 = vmatprep.subr.bf16.mxu0 %v697_v15  ;;  %678 = vmatpush3.bf16.msra.mxu1 %v675_v23 }
  0x19   :  { %680 = vmatprep.subr.bf16.mxu1 %v679_v28 }
  0x1b   :  { %584 = vmatpush3.bf16.msra.mxu0 %v697_v15 }
  0x1c   :  { %585 = vmatprep.subr.bf16.mxu0 %v698_v19  ;;  %682 = vmatpush3.bf16.msra.mxu1 %v679_v28 }
  0x1d   :  { %684 = vmatprep.subr.bf16.mxu1 %v683_v36 }
  0x1f   :  { %586 = vmatpush3.bf16.msra.mxu0 %v698_v19 }
  0x20   :  { %686 = vmatpush3.bf16.msra.mxu1 %v683_v36 }
  0x21   :  { %688 = vmatprep.subr.bf16.mxu1 %v687_v39 }
  0x22   :  { %588 = vmatmul.mubr.bf16.vlgmr.msra.gmra.mrb[0].mxu0 %v700_v24 }
  0x23   :  { %591 = vmatprep.mubr.bf16.mxu0 %v701_v27 }
  0x24   :  { %690 = vmatpush3.bf16.msra.mxu1 %v687_v39 }
  0x2a   :  { %592 = vmatmul.mubr.bf16.gmra.mrb[4].mxu0 %v702_v29 }
  0x2b   :  { %595 = vmatprep.mubr.bf16.mxu0 %v703_v30 }
  0x32   :  { %596 = vmatmul.mubr.bf16.gmra.mrb[8].mxu0 %v704_v31 }
  0x33   :  { %599 = vmatprep.mubr.bf16.mxu0 %v705_v32 }
  0x3a   :  { %600 = vmatmul.mubr.bf16.gmra.mrb[12].mxu0 %v706_v33 }
  0xf5   :  { %v589_v41 = vpop.f32.mrb[0].mxu0 }
  0xf6   :  { %v190_v42 = vpop.f32.mrb[1].mxu0  ;;  %v870_v45 = vadd.f32 %v589_v41, %v505_v40 }
  0xf7   :  { %v868_v43 = vadd.f32 %v505_v40, %v190_v42  ;;  %v590_v44 = vpop.f32.mrb[2].mxu0 }
  0xf8   :  { %v193_v46 = vpop.f32.mrb[3].mxu0  ;;  %v876_v49 = vadd.f32 %v590_v44, %v505_v40  ;;  %v256_v51 = vmul.f32 %v870_v45, %v870_v45 }
  0xf9   :  { %v872_v47 = vadd.f32 %v505_v40, %v193_v46  ;;  %v254_v48 = vmul.f32 %v868_v43, %v868_v43 }
  0xfa   :  { %v257_v54 = vmul.f32 %v876_v49, %v876_v49 }
  0xfb   :  { %v255_v50 = vmul.f32 %v872_v47, %v872_v47  ;;  %635 = vmatprep.mubr.f32.mxu1 %v254_v48 }
  0xfd   :  { %v593_v52 = vpop.f32.mrb[4].mxu0  ;;  %636 = vmatmul.mubr.f32.vlgmr.msra.gmra.mrb[0].mxu1 %v255_v50 }
  0xfe   :  { %v206_v53 = vpop.f32.mrb[5].mxu0  ;;  %638 = vmatprep.mubr.f32.mxu1 %v256_v51  ;;  %v886_v57 = vadd.f32 %v593_v52, %v505_v40 }
  0xff   :  { %v884_v55 = vadd.f32 %v505_v40, %v206_v53  ;;  %v594_v56 = vpop.f32.mrb[6].mxu0 }
 0x100   :  { %v209_v58 = vpop.f32.mrb[7].mxu0  ;;  %v892_v61 = vadd.f32 %v594_v56, %v505_v40  ;;  %v260_v63 = vmul.f32 %v886_v57, %v886_v57 }
 0x101   :  { %v258_v59 = vmul.f32 %v884_v55, %v884_v55  ;;  %v890_v60 = vadd.f32 %v505_v40, %v209_v58  ;;  %639 = vmatmul.mubr.f32.gmra.mrb[2].mxu1 %v257_v54 }
 0x102   :  { %v261_v2 = vmul.f32 %v892_v61, %v892_v61 }
 0x103   :  { %v259_v62 = vmul.f32 %v890_v60, %v890_v60  ;;  %641 = vmatprep.mubr.f32.mxu1 %v258_v59 }
 0x105   :  { %v597_v0 = vpop.f32.mrb[8].mxu0  ;;  %642 = vmatmul.mubr.f32.gmra.mrb[4].mxu1 %v259_v62 }
 0x106   :  { %v222_v1 = vpop.f32.mrb[9].mxu0  ;;  %644 = vmatprep.mubr.f32.mxu1 %v260_v63  ;;  %v902_v5 = vadd.f32 %v597_v0, %v505_v40 }
 0x107   :  { %v900_v3 = vadd.f32 %v505_v40, %v222_v1  ;;  %v598_v4 = vpop.f32.mrb[10].mxu0 }
 0x108   :  { %v225_v6 = vpop.f32.mrb[11].mxu0  ;;  %v908_v9 = vadd.f32 %v598_v4, %v505_v40  ;;  %v264_v11 = vmul.f32 %v902_v5, %v902_v5 }
 0x109   :  { %v262_v7 = vmul.f32 %v900_v3, %v900_v3  ;;  %v906_v8 = vadd.f32 %v505_v40, %v225_v6  ;;  %645 = vmatmul.mubr.f32.gmra.mrb[6].mxu1 %v261_v2 }
 0x10a   :  { %v265_v14 = vmul.f32 %v908_v9, %v908_v9 }
 0x10b   :  { %v263_v10 = vmul.f32 %v906_v8, %v906_v8  ;;  %647 = vmatprep.mubr.f32.mxu1 %v262_v7 }
 0x10d   :  { %v601_v12 = vpop.f32.mrb[12].mxu0  ;;  %648 = vmatmul.mubr.f32.gmra.mrb[8].mxu1 %v263_v10 }
 0x10e   :  { %v238_v13 = vpop.f32.mrb[13].mxu0  ;;  %650 = vmatprep.mubr.f32.mxu1 %v264_v11  ;;  %v918_v17 = vadd.f32 %v601_v12, %v505_v40 }
 0x10f   :  { %v916_v15 = vadd.f32 %v505_v40, %v238_v13  ;;  %v602_v16 = vpop.f32.mrb[14].mxu0 }
 0x110   :  { %v241_v18 = vpop.f32.mrb[15].mxu0  ;;  %v924_v21 = vadd.f32 %v602_v16, %v505_v40  ;;  %v268_v23 = vmul.f32 %v918_v17, %v918_v17 }
 0x111   :  { %v266_v19 = vmul.f32 %v916_v15, %v916_v15  ;;  %v922_v20 = vadd.f32 %v505_v40, %v241_v18  ;;  %651 = vmatmul.mubr.f32.gmra.mrb[10].mxu1 %v265_v14 }
 0x112   :  { %v269_v24 = vmul.f32 %v924_v21, %v924_v21 }
 0x113   :  { %v267_v22 = vmul.f32 %v922_v20, %v922_v20  ;;  %653 = vmatprep.mubr.f32.mxu1 %v266_v19 }
 0x115   :  { %654 = vmatmul.mubr.f32.gmra.mrb[12].mxu1 %v267_v22 }
 0x116   :  { %656 = vmatprep.mubr.f32.mxu1 %v268_v23 }
 0x119   :  { %657 = vmatmul.mubr.f32.gmra.mrb[14].mxu1 %v269_v24 }
 0x1d0   :  { %v637_v26 = vpop.f32.mrb[0].mxu1 }
 0x1d1   :  { %v438_v27 = vadd.f32 %v637_v26, %v935_v25  ;;  %v352_v28 = vpop.f32.mrb[1].mxu1 }
 0x1d2   :  { %v437_v29 = vadd.f32 %v935_v25, %v352_v28 }
 0x1d3   :  { %707 = vrsqrt.f32 %v438_v27 }
 0x1d4   :  { %709 = vrsqrt.f32 %v437_v29  ;;  %v640_v30 = vpop.f32.mrb[2].mxu1 }
 0x1d5   :  { %v440_v31 = vadd.f32 %v640_v30, %v935_v25  ;;  %v362_v32 = vpop.f32.mrb[3].mxu1 }
 0x1d6   :  { %v439_v33 = vadd.f32 %v935_v25, %v362_v32 }
 0x1d7   :  { %711 = vrsqrt.f32 %v440_v31 }
 0x1d8   :  { %713 = vrsqrt.f32 %v439_v33  ;;  %v643_v34 = vpop.f32.mrb[4].mxu1 }
 0x1d9   :  { %v442_v35 = vadd.f32 %v643_v34, %v935_v25  ;;  %v372_v36 = vpop.f32.mrb[5].mxu1 }
 0x1da   :  { %v441_v37 = vadd.f32 %v935_v25, %v372_v36 }
 0x1db   :  { %715 = vrsqrt.f32 %v442_v35 }
 0x1dc   :  { %717 = vrsqrt.f32 %v441_v37  ;;  %v646_v38 = vpop.f32.mrb[6].mxu1 }
 0x1dd   :  { %v708_v39 = vpop.eup %707  ;;  %v444_v40 = vadd.f32 %v646_v38, %v935_v25  ;;  %v382_v41 = vpop.f32.mrb[7].mxu1 }
 0x1de   :  { %v710_v42 = vpop.eup %709  ;;  %v470_v44 = vmul.f32 %v708_v39, %v872_v47  ;;  %v443_v46 = vadd.f32 %v935_v25, %v382_v41 }
 0x1df   :  { %v469_v48 = vmul.f32 %v710_v42, %v868_v43  ;;  %719 = vrsqrt.f32 %v444_v40 }
 0x1e0   :  { %486 = vst [vmem:[%s1022_s5 + $0x8] sm:$0xff] %v470_v44  ;;  %721 = vrsqrt.f32 %v443_v46  ;;  %v649_v50 = vpop.f32.mrb[8].mxu1 }
 0x1e1   :  { %v712_v51 = vpop.eup %711  ;;  %485 = vst [vmem:[%s1022_s5] sm:$0xff] %v469_v48  ;;  %v446_v52 = vadd.f32 %v649_v50, %v935_v25  ;;  %v392_v53 = vpop.f32.mrb[9].mxu1 }
 0x1e2   :  { %v714_v47 = vpop.eup %713  ;;  %v472_v54 = vmul.f32 %v712_v51, %v876_v49  ;;  %v445_v43 = vadd.f32 %v935_v25, %v392_v53 }
 0x1e3   :  { %v471_v56 = vmul.f32 %v714_v47, %v870_v45  ;;  %723 = vrsqrt.f32 %v446_v52 }
 0x1e4   :  { %488 = vst [vmem:[%s1022_s5 + $0x18] sm:$0xff] %v472_v54  ;;  %725 = vrsqrt.f32 %v445_v43  ;;  %v652_v58 = vpop.f32.mrb[10].mxu1 }
 0x1e5   :  { %v716_v59 = vpop.eup %715  ;;  %487 = vst [vmem:[%s1022_s5 + $0x10] sm:$0xff] %v471_v56  ;;  %v448_v62 = vadd.f32 %v652_v58, %v935_v25  ;;  %v402_v63 = vpop.f32.mrb[11].mxu1 }
 0x1e6   :  { %v718_v49 = vpop.eup %717  ;;  %v474_v0 = vmul.f32 %v716_v59, %v890_v60  ;;  %v447_v45 = vadd.f32 %v935_v25, %v402_v63 }
 0x1e7   :  { %v473_v1 = vmul.f32 %v718_v49, %v884_v55  ;;  %727 = vrsqrt.f32 %v448_v62 }
 0x1e8   :  { %490 = vst [vmem:[%s1022_s5 + $0x28] sm:$0xff] %v474_v0  ;;  %729 = vrsqrt.f32 %v447_v45  ;;  %v655_v2 = vpop.f32.mrb[12].mxu1 }
 0x1e9   :  { %v720_v4 = vpop.eup %719  ;;  %489 = vst [vmem:[%s1022_s5 + $0x20] sm:$0xff] %v473_v1  ;;  %v450_v6 = vadd.f32 %v655_v2, %v935_v25  ;;  %v412_v7 = vpop.f32.mrb[13].mxu1 }
 0x1ea   :  { %v722_v60 = vpop.eup %721  ;;  %v476_v10 = vmul.f32 %v720_v4, %v892_v61  ;;  %v449_v55 = vadd.f32 %v935_v25, %v412_v7 }
 0x1eb   :  { %v475_v11 = vmul.f32 %v722_v60, %v886_v57  ;;  %731 = vrsqrt.f32 %v450_v6 }
 0x1ec   :  { %492 = vst [vmem:[%s1022_s5 + $0x38] sm:$0xff] %v476_v10  ;;  %733 = vrsqrt.f32 %v449_v55  ;;  %v658_v12 = vpop.f32.mrb[14].mxu1 }
 0x1ed   :  { %v724_v13 = vpop.eup %723  ;;  %491 = vst [vmem:[%s1022_s5 + $0x30] sm:$0xff] %v475_v11  ;;  %v452_v14 = vadd.f32 %v658_v12, %v935_v25  ;;  %v422_v16 = vpop.f32.mrb[15].mxu1 }
 0x1ee   :  { %v726_v61 = vpop.eup %725  ;;  %v478_v18 = vmul.f32 %v724_v13, %v906_v8  ;;  %v451_v57 = vadd.f32 %v935_v25, %v422_v16 }
 0x1ef   :  { %v477_v19 = vmul.f32 %v726_v61, %v900_v3  ;;  %735 = vrsqrt.f32 %v452_v14 }
 0x1f0   :  { %494 = vst [vmem:[%s1022_s5 + $0x48] sm:$0xff] %v478_v18  ;;  %737 = vrsqrt.f32 %v451_v57 }
 0x1f1   :  { %v728_v22 = vpop.eup %727  ;;  %493 = vst [vmem:[%s1022_s5 + $0x40] sm:$0xff] %v477_v19 }
 0x1f2   :  { %v730_v23 = vpop.eup %729  ;;  %v480_v24 = vmul.f32 %v728_v22, %v908_v9 }
 0x1f3   :  { %v479_v8 = vmul.f32 %v730_v23, %v902_v5 }
 0x1f4   :  { %496 = vst [vmem:[%s1022_s5 + $0x58] sm:$0xff] %v480_v24 }
 0x1f5   :  { %v732_v3 = vpop.eup %731  ;;  %495 = vst [vmem:[%s1022_s5 + $0x50] sm:$0xff] %v479_v8 }
 0x1f6   :  { %v734_v25 = vpop.eup %733  ;;  %v482_v26 = vmul.f32 %v732_v3, %v922_v20 }
 0x1f7   :  { %v481_v27 = vmul.f32 %v734_v25, %v916_v15 }
 0x1f8   :  { %498 = vst [vmem:[%s1022_s5 + $0x68] sm:$0xff] %v482_v26 }
 0x1f9   :  { %v736_v9 = vpop.eup %735  ;;  %497 = vst [vmem:[%s1022_s5 + $0x60] sm:$0xff] %v481_v27 }
 0x1fa   :  { %v738_v5 = vpop.eup %737  ;;  %v484_v28 = vmul.f32 %v736_v9, %v924_v21 }
 0x1fb   :  { %v483_v29 = vmul.f32 %v738_v5, %v918_v17 }
 0x1fc   :  { %500 = vst [vmem:[%s1022_s5 + $0x78] sm:$0xff] %v484_v28 }
 0x1fd   :  { %499 = vst [vmem:[%s1022_s5 + $0x70] sm:$0xff] %v483_v29 }

// kernel: compress_and_decompress.11
= control target key start
LH: loop header
LB: loop body
LE: loop exit
PB: predicated region body
PF: predicated region fallthrough
CT: control target
= control target key end

     0   :  { %v447_v10 = vmov 0.0   ;;  %s551_s1 = inlined_call_operand.vmem [shape: bf16[128,128], index: 1, kind: input, shape index: {}]   ;;  %s552_s0 = inlined_call_operand.vmem [shape: bf16[32,128], index: 0, kind: input, shape index: {}]   ;;  %s553_s7 = inlined_call_operand.vmem [shape: f32[1,128], index: 7, kind: output, shape index: {1}]   ;;  %s554_s2 = inlined_call_operand.vmem [shape: f32[1,128], index: 2, kind: input, shape index: {}]   ;;  %s555_s3 = inlined_call_operand.vmem [shape: f32[1,128], index: 3, kind: input, shape index: {}]   ;;  %s556_s6 = inlined_call_operand.vmem [shape: f32[32,128], index: 6, kind: output, shape index: {0}]   ;;  %s557_s4 = inlined_call_operand.vmem [shape: f32[1,128], index: 4, kind: input, shape index: {}]   ;;  %s558_s5 = inlined_call_operand.vmem [shape: f32[1,128], index: 5, kind: input, shape index: {}]  }
   0x1   :  { %v397_v0 = vld [vmem:[%s551_s1] sm:$0xff]   ;;  %v398_v1 = vld [vmem:[%s551_s1 + $0x8] sm:$0xff]   ;;  %v399_v2 = vld [vmem:[%s551_s1 + $0x10] sm:$0xff]   ;;  %324 = vst [vmem:[%s553_s7] sm:$0x1] %v447_v10 }
   0x2   :  { %372 = vmatprep.subr.bf16.mxu0 %v397_v0  ;;  %v400_v3 = vld [vmem:[%s551_s1 + $0x18] sm:$0xff]   ;;  %v405_v4 = vld [vmem:[%s552_s0] sm:$0xff]   ;;  %v402_v6 = vld [vmem:[%s551_s1 + $0x28] sm:$0xff]  }
   0x3   :  { %373 = vmatpush3.bf16.msra.mxu0 %v397_v0  ;;  %388 = vmatprep.mubr.bf16.mxu0 %v405_v4  ;;  %v401_v5 = vld [vmem:[%s551_s1 + $0x20] sm:$0xff]   ;;  %v403_v7 = vld [vmem:[%s551_s1 + $0x30] sm:$0xff]   ;;  %v404_v8 = vld [vmem:[%s551_s1 + $0x38] sm:$0xff]  }
   0x4   :  { %374 = vmatprep.subr.bf16.mxu0 %v398_v1  ;;  %v406_v9 = vld [vmem:[%s552_s0 + $0x8] sm:$0xff]   ;;  %v336_v11 = vld [vmem:[%s554_s2] ss:$0 sm:$0xff] }
   0x5   :  { %v347_v20 = vld [vmem:[%s555_s3] ss:$0 sm:$0xff] }
   0x6   :  { %v348_v26 = vld [vmem:[%s557_s4] ss:$0 sm:$0xff] }
   0x7   :  { %375 = vmatpush3.bf16.msra.mxu0 %v398_v1 }
   0x8   :  { %376 = vmatprep.subr.bf16.mxu0 %v399_v2 }
   0xb   :  { %377 = vmatpush3.bf16.msra.mxu0 %v399_v2 }
   0xc   :  { %378 = vmatprep.subr.bf16.mxu0 %v400_v3 }
   0xf   :  { %379 = vmatpush3.bf16.msra.mxu0 %v400_v3 }
  0x10   :  { %380 = vmatprep.subr.bf16.mxu0 %v401_v5 }
  0x13   :  { %381 = vmatpush3.bf16.msra.mxu0 %v401_v5 }
  0x14   :  { %382 = vmatprep.subr.bf16.mxu0 %v402_v6 }
  0x17   :  { %383 = vmatpush3.bf16.msra.mxu0 %v402_v6 }
  0x18   :  { %384 = vmatprep.subr.bf16.mxu0 %v403_v7 }
  0x1b   :  { %385 = vmatpush3.bf16.msra.mxu0 %v403_v7 }
  0x1c   :  { %386 = vmatprep.subr.bf16.mxu0 %v404_v8 }
  0x1f   :  { %387 = vmatpush3.bf16.msra.mxu0 %v404_v8 }
  0x22   :  { %389 = vmatmul.mubr.bf16.vlgmr.msra.gmra.mrb[0].mxu0 %v406_v9 }
  0xf5   :  { %v390_v12 = vpop.f32.mrb[0].mxu0 }
  0xf6   :  { %v156_v13 = vadd.f32 %v390_v12, %v336_v11  ;;  %v147_v14 = vpop.f32.mrb[1].mxu0 }
  0xf7   :  { %v148_v15 = vadd.f32 %v336_v11, %v147_v14  ;;  %v391_v16 = vpop.f32.mrb[2].mxu0 }
  0xf8   :  { %v394_v17 = vround.rtne.f32 %v156_v13  ;;  %v159_v18 = vadd.f32 %v391_v16, %v336_v11  ;;  %v150_v19 = vpop.f32.mrb[3].mxu0 }
  0xf9   :  { %v392_v21 = vround.rtne.f32 %v148_v15  ;;  %v151_v22 = vadd.f32 %v336_v11, %v150_v19 }
  0xfa   :  { %168 = vst [vmem:[%s556_s6 + $0x10] sm:$0xff] %v394_v17  ;;  %v174_v23 = vadd.f32 0.5, %v394_v17  ;;  %v355_v24 = vadd.f32 -0.5, %v394_v17  ;;  %v395_v25 = vround.rtne.f32 %v159_v18 }
  0xfb   :  { %166 = vst [vmem:[%s556_s6] sm:$0xff] %v392_v21  ;;  %v172_v27 = vadd.f32 0.5, %v392_v21  ;;  %v353_v28 = vadd.f32 -0.5, %v392_v21  ;;  %v393_v29 = vround.rtne.f32 %v151_v22 }
  0xfc   :  { %v184_v30 = vmul.f32 %v347_v20, %v174_v23  ;;  %v226_v31 = vmul.f32 %v355_v24, %v347_v20  ;;  %169 = vst [vmem:[%s556_s6 + $0x18] sm:$0xff] %v395_v25  ;;  %v175_v32 = vadd.f32 0.5, %v395_v25  ;;  %v356_v33 = vadd.f32 -0.5, %v395_v25 }
  0xfd   :  { %v182_v34 = vmul.f32 %v347_v20, %v172_v27  ;;  %v224_v35 = vmul.f32 %v353_v28, %v347_v20  ;;  %167 = vst [vmem:[%s556_s6 + $0x8] sm:$0xff] %v393_v29  ;;  %v173_v36 = vadd.f32 0.5, %v393_v29  ;;  %v354_v37 = vadd.f32 -0.5, %v393_v29 }
  0xfe   :  { %v194_v38 = vadd.f32 %v348_v26, %v184_v30  ;;  %v230_v39 = vadd.f32 %v348_v26, %v226_v31  ;;  %v185_v40 = vmul.f32 %v347_v20, %v175_v32  ;;  %v227_v41 = vmul.f32 %v356_v33, %v347_v20 }
  0xff   :  { %v192_v42 = vadd.f32 %v348_v26, %v182_v34  ;;  %v228_v43 = vadd.f32 %v348_v26, %v224_v35  ;;  %v183_v44 = vmul.f32 %v347_v20, %v173_v36  ;;  %v225_v45 = vmul.f32 %v354_v37, %v347_v20 }
 0x100   :  { %v351_v46 = vmul.f32 -1.442695, %v194_v38  ;;  %v359_v47 = vmul.f32 -1.442695, %v230_v39  ;;  %v195_v48 = vadd.f32 %v348_v26, %v185_v40  ;;  %v231_v49 = vadd.f32 %v348_v26, %v227_v41  ;;  %v361_v39 = vld [vmem:[%s558_s5] ss:$0 sm:$0xff] }
 0x101   :  { %v349_v50 = vmul.f32 -1.442695, %v192_v42  ;;  %v357_v51 = vmul.f32 -1.442695, %v228_v43  ;;  %v193_v52 = vadd.f32 %v348_v26, %v183_v44  ;;  %v229_v53 = vadd.f32 %v348_v26, %v225_v45 }
 0x102   :  { %407 = vpow2.f32 %v351_v46  ;;  %v352_v54 = vmul.f32 -1.442695, %v195_v48  ;;  %v360_v55 = vmul.f32 -1.442695, %v231_v49 }
 0x103   :  { %409 = vpow2.f32 %v359_v47  ;;  %v350_v56 = vmul.f32 -1.442695, %v193_v52  ;;  %v358_v57 = vmul.f32 -1.442695, %v229_v53 }
 0x104   :  { %411 = vpow2.f32 %v349_v50 }
 0x105   :  { %413 = vpow2.f32 %v357_v51 }
 0x106   :  { %415 = vpow2.f32 %v352_v54 }
 0x107   :  { %417 = vpow2.f32 %v360_v55  ;;  %v325_v55 = vld [vmem:[%s553_s7] sm:$0x1] }
 0x108   :  { %419 = vpow2.f32 %v350_v56 }
 0x109   :  { %421 = vpow2.f32 %v358_v57 }
 0x10c   :  { %v408_v58 = vpop.eup %407 }
 0x10d   :  { %v410_v59 = vpop.eup %409  ;;  %v210_v60 = vadd.f32 1.0, %v408_v58 }
 0x10e   :  { %v412_v61 = vpop.eup %411  ;;  %v246_v62 = vadd.f32 1.0, %v410_v59 }
 0x10f   :  { %v414_v63 = vpop.eup %413  ;;  %423 = vrcp.f32 %v210_v60  ;;  %v208_v0 = vadd.f32 1.0, %v412_v61 }
 0x110   :  { %v416_v1 = vpop.eup %415  ;;  %425 = vrcp.f32 %v246_v62  ;;  %v244_v2 = vadd.f32 1.0, %v414_v63 }
 0x111   :  { %v418_v3 = vpop.eup %417  ;;  %427 = vrcp.f32 %v208_v0  ;;  %v211_v4 = vadd.f32 1.0, %v416_v1 }
 0x112   :  { %v420_v5 = vpop.eup %419  ;;  %429 = vrcp.f32 %v244_v2  ;;  %v247_v6 = vadd.f32 1.0, %v418_v3 }
 0x113   :  { %v422_v7 = vpop.eup %421  ;;  %431 = vrcp.f32 %v211_v4  ;;  %v209_v8 = vadd.f32 1.0, %v420_v5 }
 0x114   :  { %433 = vrcp.f32 %v247_v6  ;;  %v245_v9 = vadd.f32 1.0, %v422_v7 }
 0x115   :  { %435 = vrcp.f32 %v209_v8 }
 0x116   :  { %437 = vrcp.f32 %v245_v9 }
 0x119   :  { %v424_v10 = vpop.eup %423 }
 0x11a   :  { %v426_v11 = vpop.eup %425 }
 0x11b   :  { %v428_v12 = vpop.eup %427  ;;  %v258_v13 = vsub.f32 %v424_v10, %v426_v11 }
 0x11c   :  { %v430_v14 = vpop.eup %429 }
 0x11d   :  { %v432_v15 = vpop.eup %431  ;;  %v262_v16 = vmax.f32 %v258_v13, 1e-09  ;;  %v256_v17 = vsub.f32 %v428_v12, %v430_v14 }
 0x11e   :  { %v434_v18 = vpop.eup %433 }
 0x11f   :  { %v436_v19 = vpop.eup %435  ;;  %439 = vlog2.f32 %v262_v16  ;;  %v260_v20 = vmax.f32 %v256_v17, 1e-09  ;;  %v259_v21 = vsub.f32 %v432_v15, %v434_v18 }
 0x120   :  { %v438_v22 = vpop.eup %437 }
 0x121   :  { %441 = vlog2.f32 %v260_v20  ;;  %v263_v23 = vmax.f32 %v259_v21, 1e-09  ;;  %v257_v24 = vsub.f32 %v436_v19, %v438_v22 }
 0x123   :  { %443 = vlog2.f32 %v263_v23  ;;  %v261_v25 = vmax.f32 %v257_v24, 1e-09 }
 0x125   :  { %445 = vlog2.f32 %v261_v25 }
 0x129   :  { %v440_v26 = vpop.eup %439 }
 0x12a   :  { %v269_v28 = vmul.f32 0.6931472, %v440_v26 }
 0x12b   :  { %v442_v27 = vpop.eup %441 }
 0x12c   :  { %v265_v29 = vmul.f32 0.6931472, %v442_v27  ;;  %v275_v34 = vmul.f32 1.442695, %v269_v28 }
 0x12d   :  { %v444_v30 = vpop.eup %443 }
 0x12e   :  { %v273_v31 = vmul.f32 1.442695, %v265_v29  ;;  %v271_v32 = vmul.f32 0.6931472, %v444_v30  ;;  %v279_v40 = vsub.f32 0.0, %v275_v34 }
 0x12f   :  { %v446_v33 = vpop.eup %445 }
 0x130   :  { %v267_v35 = vmul.f32 0.6931472, %v446_v33  ;;  %v277_v36 = vsub.f32 0.0, %v273_v31  ;;  %v276_v37 = vmul.f32 1.442695, %v271_v32  ;;  %v309_v45 = vmul.f32 %v361_v39, %v279_v40 }
 0x132   :  { %v274_v38 = vmul.f32 1.442695, %v267_v35  ;;  %v307_v42 = vmul.f32 %v361_v39, %v277_v36  ;;  %v280_v43 = vsub.f32 0.0, %v276_v37 }
 0x134   :  { %v278_v41 = vsub.f32 0.0, %v274_v38  ;;  %v310_v47 = vmul.f32 %v361_v39, %v280_v43 }
 0x136   :  { %v308_v44 = vmul.f32 %v361_v39, %v278_v41 }
 0x138   :  { %v311_v46 = vadd.f32 %v308_v44, %v307_v42 }
 0x13a   :  { %v312_v48 = vadd.f32 %v311_v46, %v309_v45 }
 0x13c   :  { %v313_v49 = vadd.f32 %v312_v48, %v310_v47 }
 0x13e   :  { %v314_v50 = vrot.slane %v313_v49, 4 }
 0x140   :  { %v315_v51 = vadd.f32 %v314_v50, %v313_v49 }
 0x142   :  { %v316_v52 = vrot.slane %v315_v51, 2 }
 0x144   :  { %v317_v53 = vadd.f32 %v316_v52, %v315_v51 }
 0x146   :  { %v318_v54 = vrot.slane %v317_v53, 1 }
 0x148   :  { %v319_v56 = vadd.f32 %v318_v54, %v317_v53 }
 0x14a   :  { %v326_v57 = vadd.f32 %v325_v55, %v319_v56 }
 0x14c   :  { %327 = vst [vmem:[%s553_s7] sm:$0x1] %v326_v57 }

// kernel: compress_and_decompress.13
= control target key start
LH: loop header
LB: loop body
LE: loop exit
PB: predicated region body
PF: predicated region fallthrough
CT: control target
= control target key end

     0   :  { %s589_s1 = inlined_call_operand.vmem [shape: bf16[128,128], index: 1, kind: input, shape index: {}]   ;;  %s590_s0 = inlined_call_operand.vmem [shape: bf16[32,128], index: 0, kind: input, shape index: {}]   ;;  %s591_s3 = inlined_call_operand.vmem [shape: f32[128,128], index: 3, kind: input, shape index: {}]   ;;  %s592_s2 = inlined_call_operand.vmem [shape: f32[1,128], index: 2, kind: input, shape index: {}]   ;;  %s593_s4 = inlined_call_operand.vmem [shape: f32[1,128], index: 4, kind: input, shape index: {}]   ;;  %s594_s5 = inlined_call_operand.vmem [shape: f32[32,128], index: 5, kind: output, shape index: {}]  }
   0x1   :  { %v445_v0 = vld [vmem:[%s589_s1] sm:$0xff]   ;;  %v446_v1 = vld [vmem:[%s589_s1 + $0x8] sm:$0xff]   ;;  %v447_v2 = vld [vmem:[%s589_s1 + $0x10] sm:$0xff]  }
   0x2   :  { %355 = vmatprep.subr.bf16.mxu0 %v445_v0  ;;  %v448_v3 = vld [vmem:[%s589_s1 + $0x18] sm:$0xff]   ;;  %v453_v4 = vld [vmem:[%s590_s0] sm:$0xff]   ;;  %v163_v6 = vld [vmem:[%s591_s3 + $0x8] sm:$0xff] }
   0x3   :  { %356 = vmatpush3.bf16.msra.mxu0 %v445_v0  ;;  %371 = vmatprep.mubr.bf16.mxu0 %v453_v4  ;;  %v162_v5 = vld [vmem:[%s591_s3] sm:$0xff]  ;;  %v164_v7 = vld [vmem:[%s591_s3 + $0x10] sm:$0xff]  ;;  %v165_v9 = vld [vmem:[%s591_s3 + $0x18] sm:$0xff] }
   0x4   :  { %357 = vmatprep.subr.bf16.mxu0 %v446_v1  ;;  %v413_v8 = vpack.c.bf16 %v163_v6, %v162_v5  ;;  %v449_v10 = vld [vmem:[%s589_s1 + $0x20] sm:$0xff]   ;;  %v417_v11 = vpack.c.bf16 %v165_v9, %v164_v7  ;;  %v167_v13 = vld [vmem:[%s591_s3 + $0x28] sm:$0xff]  ;;  %v168_v16 = vld [vmem:[%s591_s3 + $0x30] sm:$0xff] }
   0x5   :  { %v166_v12 = vld [vmem:[%s591_s3 + $0x20] sm:$0xff]  ;;  %v450_v15 = vld [vmem:[%s589_s1 + $0x28] sm:$0xff]   ;;  %v169_v17 = vld [vmem:[%s591_s3 + $0x38] sm:$0xff] }
   0x6   :  { %414 = vmatprep.subr.bf16.mxu1 %v413_v8  ;;  %v421_v14 = vpack.c.bf16 %v167_v13, %v166_v12  ;;  %v425_v18 = vpack.c.bf16 %v169_v17, %v168_v16  ;;  %v451_v19 = vld [vmem:[%s589_s1 + $0x30] sm:$0xff]   ;;  %v170_v20 = vld [vmem:[%s591_s3 + $0x40] sm:$0xff]  ;;  %v171_v21 = vld [vmem:[%s591_s3 + $0x48] sm:$0xff] }
   0x7   :  { %358 = vmatpush3.bf16.msra.mxu0 %v446_v1  ;;  %416 = vmatpush3.bf16.msra.mxu1 %v413_v8  ;;  %v429_v22 = vpack.c.bf16 %v171_v21, %v170_v20  ;;  %v452_v23 = vld [vmem:[%s589_s1 + $0x38] sm:$0xff]   ;;  %v172_v24 = vld [vmem:[%s591_s3 + $0x50] sm:$0xff]  ;;  %v454_v27 = vld [vmem:[%s590_s0 + $0x8] sm:$0xff]  }
   0x8   :  { %359 = vmatprep.subr.bf16.mxu0 %v447_v2  ;;  %418 = vmatprep.subr.bf16.mxu1 %v417_v11  ;;  %v173_v25 = vld [vmem:[%s591_s3 + $0x58] sm:$0xff]  ;;  %v174_v28 = vld [vmem:[%s591_s3 + $0x60] sm:$0xff]  ;;  %v175_v29 = vld [vmem:[%s591_s3 + $0x68] sm:$0xff] }
   0x9   :  { %v433_v26 = vpack.c.bf16 %v173_v25, %v172_v24  ;;  %v437_v30 = vpack.c.bf16 %v175_v29, %v174_v28  ;;  %v176_v31 = vld [vmem:[%s591_s3 + $0x70] sm:$0xff]  ;;  %v177_v32 = vld [vmem:[%s591_s3 + $0x78] sm:$0xff]  ;;  %v313_v34 = vld [vmem:[%s592_s2] ss:$0 sm:$0xff] }
   0xa   :  { %v441_v33 = vpack.c.bf16 %v177_v32, %v176_v31  ;;  %v324_v47 = vld [vmem:[%s593_s4] ss:$0 sm:$0xff] }
   0xb   :  { %360 = vmatpush3.bf16.msra.mxu0 %v447_v2  ;;  %420 = vmatpush3.bf16.msra.mxu1 %v417_v11 }
   0xc   :  { %361 = vmatprep.subr.bf16.mxu0 %v448_v3  ;;  %422 = vmatprep.subr.bf16.mxu1 %v421_v14 }
   0xf   :  { %362 = vmatpush3.bf16.msra.mxu0 %v448_v3  ;;  %424 = vmatpush3.bf16.msra.mxu1 %v421_v14 }
  0x10   :  { %363 = vmatprep.subr.bf16.mxu0 %v449_v10  ;;  %426 = vmatprep.subr.bf16.mxu1 %v425_v18 }
  0x13   :  { %364 = vmatpush3.bf16.msra.mxu0 %v449_v10  ;;  %428 = vmatpush3.bf16.msra.mxu1 %v425_v18 }
  0x14   :  { %365 = vmatprep.subr.bf16.mxu0 %v450_v15  ;;  %430 = vmatprep.subr.bf16.mxu1 %v429_v22 }
  0x17   :  { %366 = vmatpush3.bf16.msra.mxu0 %v450_v15  ;;  %432 = vmatpush3.bf16.msra.mxu1 %v429_v22 }
  0x18   :  { %367 = vmatprep.subr.bf16.mxu0 %v451_v19  ;;  %434 = vmatprep.subr.bf16.mxu1 %v433_v26 }
  0x1b   :  { %368 = vmatpush3.bf16.msra.mxu0 %v451_v19  ;;  %436 = vmatpush3.bf16.msra.mxu1 %v433_v26 }
  0x1c   :  { %369 = vmatprep.subr.bf16.mxu0 %v452_v23  ;;  %438 = vmatprep.subr.bf16.mxu1 %v437_v30 }
  0x1f   :  { %370 = vmatpush3.bf16.msra.mxu0 %v452_v23  ;;  %440 = vmatpush3.bf16.msra.mxu1 %v437_v30 }
  0x20   :  { %442 = vmatprep.subr.bf16.mxu1 %v441_v33 }
  0x22   :  { %372 = vmatmul.mubr.bf16.vlgmr.msra.gmra.mrb[0].mxu0 %v454_v27 }
  0x23   :  { %444 = vmatpush3.bf16.msra.mxu1 %v441_v33 }
  0xf5   :  { %v373_v35 = vpop.f32.mrb[0].mxu0 }
  0xf6   :  { %v142_v36 = vpop.f32.mrb[1].mxu0  ;;  %v151_v39 = vadd.f32 %v373_v35, %v313_v34 }
  0xf7   :  { %v143_v37 = vadd.f32 %v313_v34, %v142_v36  ;;  %v374_v38 = vpop.f32.mrb[2].mxu0 }
  0xf8   :  { %v145_v40 = vpop.f32.mrb[3].mxu0  ;;  %v154_v43 = vadd.f32 %v374_v38, %v313_v34  ;;  %v160_v45 = vmul.f32 %v151_v39, %v151_v39 }
  0xf9   :  { %v146_v41 = vadd.f32 %v313_v34, %v145_v40  ;;  %v158_v42 = vmul.f32 %v143_v37, %v143_v37 }
  0xfa   :  { %v161_v46 = vmul.f32 %v154_v43, %v154_v43 }
  0xfb   :  { %v159_v44 = vmul.f32 %v146_v41, %v146_v41  ;;  %407 = vmatprep.mubr.f32.mxu1 %v158_v42 }
  0xfd   :  { %408 = vmatmul.mubr.f32.vlgmr.msra.gmra.mrb[0].mxu1 %v159_v44 }
  0xfe   :  { %410 = vmatprep.mubr.f32.mxu1 %v160_v45 }
 0x101   :  { %411 = vmatmul.mubr.f32.gmra.mrb[2].mxu1 %v161_v46 }
 0x1d0   :  { %v409_v48 = vpop.f32.mrb[0].mxu1 }
 0x1d1   :  { %v270_v49 = vadd.f32 %v409_v48, %v324_v47  ;;  %v244_v50 = vpop.f32.mrb[1].mxu1 }
 0x1d2   :  { %v269_v51 = vadd.f32 %v324_v47, %v244_v50 }
 0x1d3   :  { %455 = vrsqrt.f32 %v270_v49  ;;  %vm282_vm0 = vcmp.eq.f32.partialorder %v270_v49, inf  ;;  %v285_v59 = vand.u32 2147483648, %v270_v49  ;;  %vm284_vm1 = vcmp.eq.f32.partialorder %v270_v49, 0.0 }
 0x1d4   :  { %457 = vrsqrt.f32 %v269_v51  ;;  %v412_v52 = vpop.f32.mrb[2].mxu1  ;;  %vm275_vm2 = vcmp.eq.f32.partialorder %v269_v51, inf  ;;  %v278_v62 = vand.u32 2147483648, %v269_v51  ;;  %vm277_vm3 = vcmp.eq.f32.partialorder %v269_v51, 0.0 }
 0x1d5   :  { %v272_v53 = vadd.f32 %v412_v52, %v324_v47  ;;  %v254_v54 = vpop.f32.mrb[3].mxu1 }
 0x1d6   :  { %v271_v55 = vadd.f32 %v324_v47, %v254_v54 }
 0x1d7   :  { %459 = vrsqrt.f32 %v272_v53  ;;  %vm296_vm4 = vcmp.eq.f32.partialorder %v272_v53, inf  ;;  %v299_v7 = vand.u32 2147483648, %v272_v53  ;;  %vm298_vm5 = vcmp.eq.f32.partialorder %v272_v53, 0.0 }
 0x1d8   :  { %461 = vrsqrt.f32 %v271_v55  ;;  %vm289_vm6 = vcmp.eq.f32.partialorder %v271_v55, inf  ;;  %v292_v10 = vand.u32 2147483648, %v271_v55  ;;  %vm291_vm7 = vcmp.eq.f32.partialorder %v271_v55, 0.0 }
 0x1dd   :  { %v456_v56 = vpop.eup %455 }
 0x1de   :  { %v458_v57 = vpop.eup %457  ;;  %v281_v58 = vmul.f32 %v456_v56, %v270_v49 }
 0x1df   :  { %v274_v60 = vmul.f32 %v458_v57, %v269_v51 }
 0x1e0   :  { %v283_v61 = vsel %vm282_vm0, %v270_v49, %v281_v58 }
 0x1e1   :  { %v460_v63 = vpop.eup %459  ;;  %v286_v0 = vsel %vm284_vm1, %v285_v59, %v283_v61  ;;  %v276_v1 = vsel %vm275_vm2, %v269_v51, %v274_v60 }
 0x1e2   :  { %v462_v2 = vpop.eup %461  ;;  %v302_v3 = vmul.f32 %v286_v0, %v146_v41  ;;  %v279_v4 = vsel %vm277_vm3, %v278_v62, %v276_v1  ;;  %v295_v5 = vmul.f32 %v460_v63, %v272_v53 }
 0x1e3   :  { %v301_v6 = vmul.f32 %v279_v4, %v143_v37  ;;  %v288_v8 = vmul.f32 %v462_v2, %v271_v55 }
 0x1e4   :  { %306 = vst [vmem:[%s594_s5 + $0x8] sm:$0xff] %v302_v3  ;;  %v297_v9 = vsel %vm296_vm4, %v272_v53, %v295_v5 }
 0x1e5   :  { %305 = vst [vmem:[%s594_s5] sm:$0xff] %v301_v6  ;;  %v300_v11 = vsel %vm298_vm5, %v299_v7, %v297_v9  ;;  %v290_v12 = vsel %vm289_vm6, %v271_v55, %v288_v8 }
 0x1e6   :  { %v304_v13 = vmul.f32 %v300_v11, %v154_v43  ;;  %v293_v14 = vsel %vm291_vm7, %v292_v10, %v290_v12 }
 0x1e7   :  { %v303_v15 = vmul.f32 %v293_v14, %v151_v39 }
 0x1e8   :  { %308 = vst [vmem:[%s594_s5 + $0x18] sm:$0xff] %v304_v13 }
 0x1e9   :  { %307 = vst [vmem:[%s594_s5 + $0x10] sm:$0xff] %v303_v15 }

// kernel: compress_and_decompress.17
= control target key start
LH: loop header
LB: loop body
LE: loop exit
PB: predicated region body
PF: predicated region fallthrough
CT: control target
= control target key end

     0   :  { %s483_s1 = inlined_call_operand.vmem [shape: bf16[128,128], index: 1, kind: input, shape index: {}]   ;;  %s484_s0 = inlined_call_operand.vmem [shape: bf16[128,128], index: 0, kind: input, shape index: {}]   ;;  %s485_s2 = inlined_call_operand.vmem [shape: f32[1,128], index: 2, kind: input, shape index: {}]   ;;  %s486_s3 = inlined_call_operand.vmem [shape: f32[128,128], index: 3, kind: output, shape index: {}]  }
   0x1   :  { %v348_v0 = vld [vmem:[%s483_s1] sm:$0xff]   ;;  %v349_v1 = vld [vmem:[%s483_s1 + $0x8] sm:$0xff]   ;;  %v350_v2 = vld [vmem:[%s483_s1 + $0x10] sm:$0xff]  }
   0x2   :  { %300 = vmatprep.subr.bf16.mxu0 %v348_v0  ;;  %332 = vmatprep.subr.bf16.mxu1 %v348_v0  ;;  %v351_v3 = vld [vmem:[%s483_s1 + $0x18] sm:$0xff]   ;;  %v356_v4 = vld [vmem:[%s484_s0] sm:$0xff]   ;;  %v353_v7 = vld [vmem:[%s483_s1 + $0x28] sm:$0xff]  }
   0x3   :  { %301 = vmatpush3.bf16.msra.mxu0 %v348_v0  ;;  %340 = vmatpush3.bf16.msra.mxu1 %v348_v0  ;;  %v357_v5 = vld [vmem:[%s484_s0 + $0x20] sm:$0xff]   ;;  %v354_v8 = vld [vmem:[%s483_s1 + $0x30] sm:$0xff]   ;;  %v355_v9 = vld [vmem:[%s483_s1 + $0x38] sm:$0xff]  }
   0x4   :  { %302 = vmatprep.subr.bf16.mxu0 %v349_v1  ;;  %333 = vmatprep.subr.bf16.mxu1 %v349_v1  ;;  %v352_v6 = vld [vmem:[%s483_s1 + $0x20] sm:$0xff]   ;;  %v358_v10 = vld [vmem:[%s484_s0 + $0x8] sm:$0xff]   ;;  %v360_v12 = vld [vmem:[%s484_s0 + $0x10] sm:$0xff]  }
   0x5   :  { %316 = vmatprep.mubr.bf16.mxu0 %v356_v4  ;;  %324 = vmatprep.mubr.bf16.mxu1 %v357_v5  ;;  %v359_v11 = vld [vmem:[%s484_s0 + $0x28] sm:$0xff]   ;;  %v361_v13 = vld [vmem:[%s484_s0 + $0x30] sm:$0xff]   ;;  %v362_v14 = vld [vmem:[%s484_s0 + $0x18] sm:$0xff]  }
   0x6   :  { %v363_v15 = vld [vmem:[%s484_s0 + $0x38] sm:$0xff]   ;;  %v267_v16 = vld [vmem:[%s485_s2] ss:$0 sm:$0xff] }
   0x7   :  { %303 = vmatpush3.bf16.msra.mxu0 %v349_v1  ;;  %341 = vmatpush3.bf16.msra.mxu1 %v349_v1 }
   0x8   :  { %304 = vmatprep.subr.bf16.mxu0 %v350_v2  ;;  %334 = vmatprep.subr.bf16.mxu1 %v350_v2 }
   0xb   :  { %305 = vmatpush3.bf16.msra.mxu0 %v350_v2  ;;  %342 = vmatpush3.bf16.msra.mxu1 %v350_v2 }
   0xc   :  { %306 = vmatprep.subr.bf16.mxu0 %v351_v3  ;;  %335 = vmatprep.subr.bf16.mxu1 %v351_v3 }
   0xf   :  { %307 = vmatpush3.bf16.msra.mxu0 %v351_v3  ;;  %343 = vmatpush3.bf16.msra.mxu1 %v351_v3 }
  0x10   :  { %308 = vmatprep.subr.bf16.mxu0 %v352_v6  ;;  %336 = vmatprep.subr.bf16.mxu1 %v352_v6 }
  0x13   :  { %309 = vmatpush3.bf16.msra.mxu0 %v352_v6  ;;  %344 = vmatpush3.bf16.msra.mxu1 %v352_v6 }
  0x14   :  { %310 = vmatprep.subr.bf16.mxu0 %v353_v7  ;;  %337 = vmatprep.subr.bf16.mxu1 %v353_v7 }
  0x17   :  { %311 = vmatpush3.bf16.msra.mxu0 %v353_v7  ;;  %345 = vmatpush3.bf16.msra.mxu1 %v353_v7 }
  0x18   :  { %312 = vmatprep.subr.bf16.mxu0 %v354_v8  ;;  %338 = vmatprep.subr.bf16.mxu1 %v354_v8 }
  0x1b   :  { %313 = vmatpush3.bf16.msra.mxu0 %v354_v8  ;;  %346 = vmatpush3.bf16.msra.mxu1 %v354_v8 }
  0x1c   :  { %314 = vmatprep.subr.bf16.mxu0 %v355_v9  ;;  %339 = vmatprep.subr.bf16.mxu1 %v355_v9 }
  0x1f   :  { %315 = vmatpush3.bf16.msra.mxu0 %v355_v9  ;;  %347 = vmatpush3.bf16.msra.mxu1 %v355_v9 }
  0x22   :  { %317 = vmatmul.mubr.bf16.vlgmr.msra.gmra.mrb[0].mxu0 %v358_v10  ;;  %325 = vmatmul.mubr.bf16.vlgmr.msra.gmra.mrb[0].mxu1 %v359_v11 }
  0x23   :  { %320 = vmatprep.mubr.bf16.mxu0 %v360_v12  ;;  %328 = vmatprep.mubr.bf16.mxu1 %v361_v13 }
  0x2a   :  { %321 = vmatmul.mubr.bf16.gmra.mrb[4].mxu0 %v362_v14  ;;  %329 = vmatmul.mubr.bf16.gmra.mrb[4].mxu1 %v363_v15 }
  0xf5   :  { %v318_v17 = vpop.f32.mrb[0].mxu0  ;;  %v326_v18 = vpop.f32.mrb[0].mxu1 }
  0xf6   :  { %v193_v19 = vadd.f32 %v318_v17, %v267_v16  ;;  %v225_v20 = vadd.f32 %v326_v18, %v267_v16  ;;  %v184_v21 = vpop.f32.mrb[1].mxu0  ;;  %v216_v22 = vpop.f32.mrb[1].mxu1 }
  0xf7   :  { %v185_v23 = vadd.f32 %v267_v16, %v184_v21  ;;  %v217_v24 = vadd.f32 %v267_v16, %v216_v22  ;;  %v319_v25 = vpop.f32.mrb[2].mxu0  ;;  %v327_v26 = vpop.f32.mrb[2].mxu1 }
  0xf8   :  { %249 = vst [vmem:[%s486_s3 + $0x10] sm:$0xff] %v193_v19  ;;  %257 = vst [vmem:[%s486_s3 + $0x50] sm:$0xff] %v225_v20  ;;  %v196_v27 = vadd.f32 %v319_v25, %v267_v16  ;;  %v228_v28 = vadd.f32 %v327_v26, %v267_v16  ;;  %v187_v29 = vpop.f32.mrb[3].mxu0  ;;  %v219_v30 = vpop.f32.mrb[3].mxu1 }
  0xf9   :  { %247 = vst [vmem:[%s486_s3] sm:$0xff] %v185_v23  ;;  %255 = vst [vmem:[%s486_s3 + $0x40] sm:$0xff] %v217_v24  ;;  %v188_v31 = vadd.f32 %v267_v16, %v187_v29  ;;  %v220_v32 = vadd.f32 %v267_v16, %v219_v30 }
  0xfa   :  { %250 = vst [vmem:[%s486_s3 + $0x18] sm:$0xff] %v196_v27  ;;  %258 = vst [vmem:[%s486_s3 + $0x58] sm:$0xff] %v228_v28 }
  0xfb   :  { %248 = vst [vmem:[%s486_s3 + $0x8] sm:$0xff] %v188_v31  ;;  %256 = vst [vmem:[%s486_s3 + $0x48] sm:$0xff] %v220_v32 }
  0xfd   :  { %v322_v33 = vpop.f32.mrb[4].mxu0  ;;  %v330_v34 = vpop.f32.mrb[4].mxu1 }
  0xfe   :  { %v209_v35 = vadd.f32 %v322_v33, %v267_v16  ;;  %v241_v36 = vadd.f32 %v330_v34, %v267_v16  ;;  %v200_v37 = vpop.f32.mrb[5].mxu0  ;;  %v232_v38 = vpop.f32.mrb[5].mxu1 }
  0xff   :  { %v201_v39 = vadd.f32 %v267_v16, %v200_v37  ;;  %v233_v40 = vadd.f32 %v267_v16, %v232_v38  ;;  %v323_v41 = vpop.f32.mrb[6].mxu0  ;;  %v331_v42 = vpop.f32.mrb[6].mxu1 }
 0x100   :  { %253 = vst [vmem:[%s486_s3 + $0x30] sm:$0xff] %v209_v35  ;;  %261 = vst [vmem:[%s486_s3 + $0x70] sm:$0xff] %v241_v36  ;;  %v212_v43 = vadd.f32 %v323_v41, %v267_v16  ;;  %v244_v44 = vadd.f32 %v331_v42, %v267_v16  ;;  %v203_v45 = vpop.f32.mrb[7].mxu0  ;;  %v235_v46 = vpop.f32.mrb[7].mxu1 }
 0x101   :  { %251 = vst [vmem:[%s486_s3 + $0x20] sm:$0xff] %v201_v39  ;;  %259 = vst [vmem:[%s486_s3 + $0x60] sm:$0xff] %v233_v40  ;;  %v204_v47 = vadd.f32 %v267_v16, %v203_v45  ;;  %v236_v48 = vadd.f32 %v267_v16, %v235_v46 }
 0x102   :  { %254 = vst [vmem:[%s486_s3 + $0x38] sm:$0xff] %v212_v43  ;;  %262 = vst [vmem:[%s486_s3 + $0x78] sm:$0xff] %v244_v44 }
 0x103   :  { %252 = vst [vmem:[%s486_s3 + $0x28] sm:$0xff] %v204_v47  ;;  %260 = vst [vmem:[%s486_s3 + $0x68] sm:$0xff] %v236_v48 }

</bundles_post_ra>
